<compile_context>
chip_gen: v6e
topology: v6e:2x2x1
jax: 0.10.0
libtpu: 0.0.40
codegen_flags: <defaults>
</compile_context>

<pallas_src>
import functools

import jax
import jax.numpy as jnp
from jax import lax
from jax.experimental import pallas as pl
from jax.experimental.pallas import tpu as pltpu


def _vmem_and_cores():
    """(physical VMEM bytes per core, TensorCores per chip) with safe fallback."""
    try:
        info = pltpu.get_tpu_info()
        vmem = int(getattr(info, "vmem_capacity_bytes", 0)) or (64 << 20)
    except Exception:
        vmem = 64 << 20                     # conservative: assume smallest VMEM
    # v7x: 64 MiB VMEM per TC and 2 TCs/chip; v5e/v6e: 128 MiB, 1 TC/chip.
    num_tc = 2 if vmem <= (64 << 20) else 1
    return vmem, num_tc


def mam_kernel(x_ref, w1t_ref, b1_ref, w2_ref, b2_ref, dww_ref, dwb_ref, o_ref,
               *, height, width, n_total):
    # x_ref : (nb, C, H*W)  lane-dense, channels on sublanes
    # w1t   : (C, Cr)   conv_du[0] weight, transposed
    # b1    : (1, Cr)
    # w2    : (C, Cr)   conv_du[2] weight
    # b2    : (C, 1)
    # dww   : (C, 9)    depthwise 3x3 weights, channel-major, tap index on lanes
    # dwb   : (C, 1)
    nb, _, hw = x_ref.shape

    w1t = w1t_ref[...]
    b1 = b1_ref[...]
    w2 = w2_ref[...]
    b2 = b2_ref[...]
    dww = dww_ref[...]
    dwb = dwb_ref[...]

    # Masks for the zero-padded 3x3 depthwise conv, built once per grid step
    # and reused for every image in the block.
    p_idx = lax.broadcasted_iota(jnp.int32, (1, hw), 1)
    col = p_idx % width
    keep_not_last_col = col != (width - 1)      # zero input col W-1 (kj=0 taps)
    keep_not_first_col = col != 0               # zero input col 0   (kj=2 taps)
    row_ok_top = p_idx >= width                 # ki=0 taps invalid on out row 0
    row_ok_bot = p_idx < (height - 1) * width   # ki=2 taps invalid on row H-1

    inv_hw = 1.0 / hw
    inv_hwm1 = 1.0 / max(hw - 1, 1)

    # Clamp the per-block image count so a ragged last block (grid=cdiv(N,nb))
    # never computes on stale VMEM.  Static when nb divides N.
    if n_total % nb == 0:
        n_valid = nb
    else:
        n_valid = jnp.minimum(nb, n_total - pl.program_id(0) * nb)

    def body(n, carry):
        x = x_ref[n]                                          # (C, H*W)

        # torch.var(x, dim=(2,3), keepdim=True): unbiased, one pass (f32 acc).
        s1 = jnp.sum(x, axis=1, keepdims=True)                # (C, 1)
        s2 = jnp.sum(x * x, axis=1, keepdims=True)            # (C, 1)
        var = (s2 - s1 * s1 * inv_hw) * inv_hwm1              # (C, 1)

        # F.normalize(var, p=2, dim=1): L2 normalize across channels.
        nrm = jnp.sqrt(jnp.sum(var * var, axis=0, keepdims=True))   # (1, 1)
        var_n = var / jnp.maximum(nrm, 1e-12)                       # (C, 1)

        # conv_du: 1x1 conv -> ReLU -> 1x1 conv on the per-channel vector.
        h = jnp.sum(w1t * var_n, axis=0, keepdims=True) + b1        # (1, Cr)
        h = jnp.maximum(h, 0.0)
        ca = jnp.sum(w2 * h, axis=1, keepdims=True) + b2            # (C, 1)

        # csd: depthwise 3x3, padding=1, groups=C.  9 lane rolls; column
        # boundaries handled by two pre-zeroed copies of x, row boundaries by
        # one mask each on the accumulated top/bottom partial sums.
        x_l = jnp.where(keep_not_last_col, x, 0.0)   # kj=0 taps never read col W-1
        x_r = jnp.where(keep_not_first_col, x, 0.0)  # kj=2 taps never read col 0

        def tap(src, ki, kj):
            off = (ki - 1) * width + (kj - 1)
            k = ki * 3 + kj
            w_k = dww[:, k:k + 1]                                    # (C, 1)
            sh = src if off == 0 else pltpu.roll(src, shift=(-off) % hw, axis=1)
            return w_k * sh

        top = tap(x_l, 0, 0) + tap(x, 0, 1) + tap(x_r, 0, 2)
        mid = tap(x_l, 1, 0) + tap(x, 1, 1) + tap(x_r, 1, 2)
        bot = tap(x_l, 2, 0) + tap(x, 2, 1) + tap(x_r, 2, 2)
        spatial = (jnp.where(row_ok_top, top, 0.0) + mid
                   + jnp.where(row_ok_bot, bot, 0.0))

        # y = sigmoid(var_n + ca + csd).  Fold the small (C,1) terms into one
        # negated bias so no full-tile negate is needed; exp and the
        # approximate reciprocal both stay on the EUP slot.
        neg_bias = -(var_n + ca + dwb)                               # (C, 1)
        e = jnp.exp(neg_bias - spatial)                              # EUP
        y = pl.reciprocal(1.0 + e, approx=True)                      # EUP
        o_ref[n] = (x * y).astype(o_ref.dtype)
        return carry

    lax.fori_loop(0, n_valid, body, None)


def mam_layer(x_nchw, params):
    """MAMLayer forward. x_nchw: (N, C, H, W) float32, PyTorch layout."""
    W1, b1, W2, b2, dw_w, dw_b = params
    N, C, H, W = x_nchw.shape
    Cr = W1.shape[0]
    hw = H * W

    # Free reshape of contiguous NCHW: no transpose / pad passes over HBM.
    x_flat = x_nchw.reshape(N, C, hw)

    w1t = W1.T                                   # (C, Cr)
    b1r = b1.reshape(1, Cr)
    w2m = W2.reshape(C, Cr)
    b2r = b2.reshape(C, 1)
    dww = dw_w.reshape(C, 9)                     # channel-major, tap on lanes
    dwb = dw_b.reshape(C, 1)

    # Generation-aware VMEM budgeting:
    #   v5e/v6e (128 MiB physical): limit ~96 MiB, block budget ~48 MiB
    #   v7x     (64 MiB physical) : limit ~48 MiB, block budget ~24 MiB
    vmem_phys, num_tc = _vmem_and_cores()
    vmem_limit = min((vmem_phys * 3) // 4, 100 * 1024 * 1024)
    block_budget = vmem_limit // 2               # in + out, double-buffered (4x)
    img_bytes = C * hw * x_nchw.dtype.itemsize
    nb = max(1, min(N, block_budget // max(1, 4 * img_bytes)))
    # Only keep >= 2 grid steps on multi-TensorCore chips (v7x), where the
    # parallel batch axis can shard across cores; on v5e/v6e the grid is a
    # sequential loop, so take the largest block that fits.
    if num_tc >= 2 and N > 1 and nb >= N:
        nb = pl.cdiv(N, 2)
    grid = pl.cdiv(N, nb)                        # ragged last block allowed

    # TODO(synk): add an hw-tiled two-pass path (stats pass + apply pass) for
    # images whose single (C, H*W) tile exceeds the per-block VMEM budget.

    kernel = functools.partial(mam_kernel, height=H, width=W, n_total=N)
    out_flat = pl.pallas_call(
        kernel,
        out_shape=jax.ShapeDtypeStruct((N, C, hw), x_nchw.dtype),
        grid_spec=pltpu.PrefetchScalarGridSpec(
            num_scalar_prefetch=0,
            grid=(grid,),
            in_specs=[
                pl.BlockSpec((nb, C, hw), lambda b: (b, 0, 0)),
                pl.BlockSpec((C, Cr), lambda b: (0, 0)),
                pl.BlockSpec((1, Cr), lambda b: (0, 0)),
                pl.BlockSpec((C, Cr), lambda b: (0, 0)),
                pl.BlockSpec((C, 1), lambda b: (0, 0)),
                pl.BlockSpec((C, 9), lambda b: (0, 0)),
                pl.BlockSpec((C, 1), lambda b: (0, 0)),
            ],
            out_specs=pl.BlockSpec((nb, C, hw), lambda b: (b, 0, 0)),
        ),
        compiler_params=pltpu.CompilerParams(
            dimension_semantics=("parallel",),
            vmem_limit_bytes=int(vmem_limit),
        ),
    )(x_flat, w1t, b1r, w2m, b2r, dww, dwb)

    return out_flat.reshape(N, C, H, W)


def mam_ref(x, params):
    """Pure-JAX reference mirroring the PyTorch forward (NCHW)."""
    W1, b1, W2, b2, dw_w, dw_b = params
    N, C, H, W = x.shape
    var = jnp.var(x, axis=(2, 3), keepdims=True, ddof=1)
    norm = jnp.sqrt(jnp.sum(var * var, axis=1, keepdims=True))
    var_n = var / jnp.maximum(norm, 1e-12)
    h = jnp.einsum('oc,nchw->nohw', W1, var_n) + b1[None, :, None, None]
    h = jnp.maximum(h, 0.0)
    ca = jnp.einsum('oc,nchw->nohw', W2, h) + b2[None, :, None, None]
    csd = lax.conv_general_dilated(
        x, dw_w.reshape(C, 1, 3, 3),
        window_strides=(1, 1), padding='SAME',
        feature_group_count=C,
        dimension_numbers=('NCHW', 'OIHW', 'NCHW'))
    csd = csd + dw_b[None, :, None, None]
    y = jax.nn.sigmoid(var_n + ca + csd)
    return x * y


if __name__ == "__main__":
    # channels must be >= reduction(=16) so that channels // reduction >= 1
    N, C, H, W = 2, 32, 16, 16
    reduction = 16
    Cr = C // reduction

    key = jax.random.PRNGKey(0)
    keys = jax.random.split(key, 7)
    x = jax.random.normal(keys[0], (N, C, H, W), jnp.float32)

    # deterministic synthetic parameters (shapes follow the module __init__)
    W1 = jax.random.normal(keys[1], (Cr, C), jnp.float32) * 0.1      # conv_du[0] weight (Cr,C,1,1)
    b1 = jax.random.normal(keys[2], (Cr,), jnp.float32) * 0.1        # conv_du[0] bias
    W2 = jax.random.normal(keys[3], (C, Cr), jnp.float32) * 0.1      # conv_du[2] weight (C,Cr,1,1)
    b2 = jax.random.normal(keys[4], (C,), jnp.float32) * 0.1         # conv_du[2] bias
    dw_w = jax.random.normal(keys[5], (C, 3, 3), jnp.float32) * 0.1  # csd weight (C,1,3,3)
    dw_b = jax.random.normal(keys[6], (C,), jnp.float32) * 0.1       # csd bias
    params = (W1, b1, W2, b2, dw_w, dw_b)

    out = mam_layer(x, params)
    out = jax.block_until_ready(out)

    ref = mam_ref(x, params)
    assert out.shape == ref.shape == (N, C, H, W)
    # Tolerance accounts for the in-kernel sigmoid using the EUP approximate
    # reciprocal (pl.reciprocal(..., approx=True)); everything else is f32.
    assert jnp.allclose(out, ref, rtol=5e-3, atol=5e-3), \
        f"max abs err = {float(jnp.max(jnp.abs(out - ref)))}"
    print("KERNEL_OK")
</pallas_src>

<mosaic_0001>
module attributes {stable_mosaic.version = 11 : i64} {
  func.func @mam_kernel(%arg0: i32, %arg1: memref<1x32x256xf32, #tpu.memory_space<vmem>>, %arg2: memref<32x2xf32, #tpu.memory_space<vmem>>, %arg3: memref<1x2xf32, #tpu.memory_space<vmem>>, %arg4: memref<32x2xf32, #tpu.memory_space<vmem>>, %arg5: memref<32x1xf32, #tpu.memory_space<vmem>>, %arg6: memref<32x9xf32, #tpu.memory_space<vmem>>, %arg7: memref<32x1xf32, #tpu.memory_space<vmem>>, %arg8: memref<1x32x256xf32, #tpu.memory_space<vmem>>) attributes {dimension_semantics = [#tpu.dimension_semantics<parallel>], iteration_bounds = array<i64: 2>, scalar_prefetch = 0 : i64, scratch_operands = 0 : i64, tpu.core_type = #tpu.core_type<tc>, window_params = [{transform_indices = @transform_0, window_bounds = array<i64: 1, 32, 256>}, {pipeline_mode = #tpu.pipeline_mode<synchronous>, transform_indices = @transform_1, window_bounds = array<i64: 32, 2>}, {pipeline_mode = #tpu.pipeline_mode<synchronous>, transform_indices = @transform_2, window_bounds = array<i64: 1, 2>}, {pipeline_mode = #tpu.pipeline_mode<synchronous>, transform_indices = @transform_3, window_bounds = array<i64: 32, 2>}, {pipeline_mode = #tpu.pipeline_mode<synchronous>, transform_indices = @transform_4, window_bounds = array<i64: 32, 1>}, {pipeline_mode = #tpu.pipeline_mode<synchronous>, transform_indices = @transform_5, window_bounds = array<i64: 32, 9>}, {pipeline_mode = #tpu.pipeline_mode<synchronous>, transform_indices = @transform_6, window_bounds = array<i64: 32, 1>}, {transform_indices = @transform_7, window_bounds = array<i64: 1, 32, 256>}]} {
    %c0 = arith.constant 0 : index
    %c0_0 = arith.constant 0 : index
    %0 = vector.load %arg2[%c0, %c0_0] : memref<32x2xf32, #tpu.memory_space<vmem>>, vector<32x2xf32>
    %c0_1 = arith.constant 0 : index
    %c0_2 = arith.constant 0 : index
    %1 = vector.load %arg3[%c0_1, %c0_2] : memref<1x2xf32, #tpu.memory_space<vmem>>, vector<1x2xf32>
    %c0_3 = arith.constant 0 : index
    %c0_4 = arith.constant 0 : index
    %2 = vector.load %arg4[%c0_3, %c0_4] : memref<32x2xf32, #tpu.memory_space<vmem>>, vector<32x2xf32>
    %c0_5 = arith.constant 0 : index
    %c0_6 = arith.constant 0 : index
    %3 = vector.load %arg5[%c0_5, %c0_6] : memref<32x1xf32, #tpu.memory_space<vmem>>, vector<32x1xf32>
    %c0_7 = arith.constant 0 : index
    %c0_8 = arith.constant 0 : index
    %4 = vector.load %arg6[%c0_7, %c0_8] : memref<32x9xf32, #tpu.memory_space<vmem>>, vector<32x9xf32>
    %c0_9 = arith.constant 0 : index
    %c0_10 = arith.constant 0 : index
    %5 = vector.load %arg7[%c0_9, %c0_10] : memref<32x1xf32, #tpu.memory_space<vmem>>, vector<32x1xf32>
    %6 = tpu.iota {dimensions = array<i32: 1>} : vector<1x256xi32>
    %c16_i32 = arith.constant 16 : i32
    %c0_i32 = arith.constant 0 : i32
    %7 = arith.cmpi eq, %c16_i32, %c0_i32 : i32
    %c1_i32 = arith.constant 1 : i32
    %8 = arith.select %7, %c1_i32, %c16_i32 : i32
    %9 = vector.broadcast %8 : i32 to vector<1x256xi32>
    %10 = arith.remsi %6, %9 : vector<1x256xi32>
    %c0_i32_11 = arith.constant 0 : i32
    %11 = vector.broadcast %c0_i32_11 : i32 to vector<1x256xi32>
    %12 = arith.cmpi ne, %10, %11 : vector<1x256xi32>
    %c0_i32_12 = arith.constant 0 : i32
    %13 = vector.broadcast %c0_i32_12 : i32 to vector<1x256xi32>
    %14 = arith.cmpi slt, %10, %13 : vector<1x256xi32>
    %c0_i32_13 = arith.constant 0 : i32
    %15 = arith.cmpi slt, %8, %c0_i32_13 : i32
    %16 = vector.broadcast %15 : i1 to vector<1x256xi1>
    %17 = vector.broadcast %16 : vector<1x256xi1> to vector<1x256xi1>
    %18 = arith.xori %14, %17 : vector<1x256xi1>
    %19 = arith.andi %18, %12 : vector<1x256xi1>
    %20 = vector.broadcast %8 : i32 to vector<1x256xi32>
    %21 = arith.addi %10, %20 : vector<1x256xi32>
    %22 = arith.select %19, %21, %10 : vector<1x256xi1>, vector<1x256xi32>
    %c15_i32 = arith.constant 15 : i32
    %23 = vector.broadcast %c15_i32 : i32 to vector<1x256xi32>
    %24 = arith.cmpi ne, %22, %23 : vector<1x256xi32>
    %c0_i32_14 = arith.constant 0 : i32
    %25 = vector.broadcast %c0_i32_14 : i32 to vector<1x256xi32>
    %26 = arith.cmpi ne, %22, %25 : vector<1x256xi32>
    %c16_i32_15 = arith.constant 16 : i32
    %27 = vector.broadcast %c16_i32_15 : i32 to vector<1x256xi32>
    %28 = arith.cmpi sge, %6, %27 : vector<1x256xi32>
    %c240_i32 = arith.constant 240 : i32
    %29 = vector.broadcast %c240_i32 : i32 to vector<1x256xi32>
    %30 = arith.cmpi slt, %6, %29 : vector<1x256xi32>
    %c0_i32_16 = arith.constant 0 : i32
    %31 = arith.index_cast %c0_i32_16 : i32 to index
    %c0_17 = arith.constant 0 : index
    %c0_18 = arith.constant 0 : index
    %32 = vector.load %arg1[%31, %c0_17, %c0_18] : memref<1x32x256xf32, #tpu.memory_space<vmem>>, vector<1x32x256xf32>
    %33 = vector.shape_cast %32 : vector<1x32x256xf32> to vector<32x256xf32>
    %cst = arith.constant dense<0.000000e+00> : vector<32xf32>
    %34 = vector.multi_reduction <add>, %33, %cst [1] : vector<32x256xf32> to vector<32xf32>
    %35 = vector.shape_cast %34 : vector<32xf32> to vector<32x1xf32>
    %36 = arith.mulf %33, %33 : vector<32x256xf32>
    %cst_19 = arith.constant dense<0.000000e+00> : vector<32xf32>
    %37 = vector.multi_reduction <add>, %36, %cst_19 [1] : vector<32x256xf32> to vector<32xf32>
    %38 = vector.shape_cast %37 : vector<32xf32> to vector<32x1xf32>
    %39 = arith.mulf %35, %35 : vector<32x1xf32>
    %cst_20 = arith.constant 3.906250e-03 : f32
    %40 = vector.broadcast %cst_20 : f32 to vector<32x1xf32>
    %41 = arith.mulf %39, %40 : vector<32x1xf32>
    %42 = arith.subf %38, %41 : vector<32x1xf32>
    %cst_21 = arith.constant 0.00392156886 : f32
    %43 = vector.broadcast %cst_21 : f32 to vector<32x1xf32>
    %44 = arith.mulf %42, %43 : vector<32x1xf32>
    %45 = arith.mulf %44, %44 : vector<32x1xf32>
    %cst_22 = arith.constant dense<0.000000e+00> : vector<1xf32>
    %46 = vector.multi_reduction <add>, %45, %cst_22 [0] : vector<32x1xf32> to vector<1xf32>
    %47 = vector.shape_cast %46 : vector<1xf32> to vector<1x1xf32>
    %48 = math.sqrt %47 : vector<1x1xf32>
    %cst_23 = arith.constant 9.99999996E-13 : f32
    %49 = vector.broadcast %cst_23 : f32 to vector<1x1xf32>
    %50 = arith.maximumf %48, %49 : vector<1x1xf32>
    %51 = vector.broadcast %50 : vector<1x1xf32> to vector<32x1xf32>
    %52 = arith.divf %44, %51 : vector<32x1xf32>
    %53 = vector.broadcast %52 : vector<32x1xf32> to vector<32x2xf32>
    %54 = arith.mulf %0, %53 : vector<32x2xf32>
    %cst_24 = arith.constant dense<0.000000e+00> : vector<2xf32>
    %55 = vector.multi_reduction <add>, %54, %cst_24 [0] : vector<32x2xf32> to vector<2xf32>
    %56 = vector.shape_cast %55 : vector<2xf32> to vector<1x2xf32>
    %57 = arith.addf %56, %1 : vector<1x2xf32>
    %cst_25 = arith.constant 0.000000e+00 : f32
    %58 = vector.broadcast %cst_25 : f32 to vector<1x2xf32>
    %59 = arith.maximumf %57, %58 : vector<1x2xf32>
    %60 = vector.broadcast %59 : vector<1x2xf32> to vector<32x2xf32>
    %61 = arith.mulf %2, %60 : vector<32x2xf32>
    %cst_26 = arith.constant dense<0.000000e+00> : vector<32xf32>
    %62 = vector.multi_reduction <add>, %61, %cst_26 [1] : vector<32x2xf32> to vector<32xf32>
    %63 = vector.shape_cast %62 : vector<32xf32> to vector<32x1xf32>
    %64 = arith.addf %63, %3 : vector<32x1xf32>
    %cst_27 = arith.constant 0.000000e+00 : f32
    %65 = vector.shape_cast %24 : vector<1x256xi1> to vector<1x256xi1>
    %66 = vector.broadcast %65 : vector<1x256xi1> to vector<32x256xi1>
    %67 = vector.broadcast %cst_27 : f32 to vector<32x256xf32>
    %68 = arith.select %66, %33, %67 : vector<32x256xi1>, vector<32x256xf32>
    %cst_28 = arith.constant 0.000000e+00 : f32
    %69 = vector.shape_cast %26 : vector<1x256xi1> to vector<1x256xi1>
    %70 = vector.broadcast %69 : vector<1x256xi1> to vector<32x256xi1>
    %71 = vector.broadcast %cst_28 : f32 to vector<32x256xf32>
    %72 = arith.select %70, %33, %71 : vector<32x256xi1>, vector<32x256xf32>
    %73 = vector.extract_strided_slice %4 {offsets = [0, 0], sizes = [32, 1], strides = [1, 1]} : vector<32x9xf32> to vector<32x1xf32>
    %c17_i32 = arith.constant 17 : i32
    %74 = tpu.dynamic_rotate %68 by %c17_i32 dim 1 : vector<32x256xf32>, i32 -> vector<32x256xf32>
    %75 = vector.broadcast %73 : vector<32x1xf32> to vector<32x256xf32>
    %76 = arith.mulf %75, %74 : vector<32x256xf32>
    %77 = vector.extract_strided_slice %4 {offsets = [0, 1], sizes = [32, 1], strides = [1, 1]} : vector<32x9xf32> to vector<32x1xf32>
    %c16_i32_29 = arith.constant 16 : i32
    %78 = tpu.dynamic_rotate %33 by %c16_i32_29 dim 1 : vector<32x256xf32>, i32 -> vector<32x256xf32>
    %79 = vector.broadcast %77 : vector<32x1xf32> to vector<32x256xf32>
    %80 = arith.mulf %79, %78 : vector<32x256xf32>
    %81 = arith.addf %76, %80 : vector<32x256xf32>
    %82 = vector.extract_strided_slice %4 {offsets = [0, 2], sizes = [32, 1], strides = [1, 1]} : vector<32x9xf32> to vector<32x1xf32>
    %c15_i32_30 = arith.constant 15 : i32
    %83 = tpu.dynamic_rotate %72 by %c15_i32_30 dim 1 : vector<32x256xf32>, i32 -> vector<32x256xf32>
    %84 = vector.broadcast %82 : vector<32x1xf32> to vector<32x256xf32>
    %85 = arith.mulf %84, %83 : vector<32x256xf32>
    %86 = arith.addf %81, %85 : vector<32x256xf32>
    %87 = vector.extract_strided_slice %4 {offsets = [0, 3], sizes = [32, 1], strides = [1, 1]} : vector<32x9xf32> to vector<32x1xf32>
    %c1_i32_31 = arith.constant 1 : i32
    %88 = tpu.dynamic_rotate %68 by %c1_i32_31 dim 1 : vector<32x256xf32>, i32 -> vector<32x256xf32>
    %89 = vector.broadcast %87 : vector<32x1xf32> to vector<32x256xf32>
    %90 = arith.mulf %89, %88 : vector<32x256xf32>
    %91 = vector.extract_strided_slice %4 {offsets = [0, 4], sizes = [32, 1], strides = [1, 1]} : vector<32x9xf32> to vector<32x1xf32>
    %92 = vector.broadcast %91 : vector<32x1xf32> to vector<32x256xf32>
    %93 = arith.mulf %92, %33 : vector<32x256xf32>
    %94 = arith.addf %90, %93 : vector<32x256xf32>
    %95 = vector.extract_strided_slice %4 {offsets = [0, 5], sizes = [32, 1], strides = [1, 1]} : vector<32x9xf32> to vector<32x1xf32>
    %c255_i32 = arith.constant 255 : i32
    %96 = tpu.dynamic_rotate %72 by %c255_i32 dim 1 : vector<32x256xf32>, i32 -> vector<32x256xf32>
    %97 = vector.broadcast %95 : vector<32x1xf32> to vector<32x256xf32>
    %98 = arith.mulf %97, %96 : vector<32x256xf32>
    %99 = arith.addf %94, %98 : vector<32x256xf32>
    %100 = vector.extract_strided_slice %4 {offsets = [0, 6], sizes = [32, 1], strides = [1, 1]} : vector<32x9xf32> to vector<32x1xf32>
    %c241_i32 = arith.constant 241 : i32
    %101 = tpu.dynamic_rotate %68 by %c241_i32 dim 1 : vector<32x256xf32>, i32 -> vector<32x256xf32>
    %102 = vector.broadcast %100 : vector<32x1xf32> to vector<32x256xf32>
    %103 = arith.mulf %102, %101 : vector<32x256xf32>
    %104 = vector.extract_strided_slice %4 {offsets = [0, 7], sizes = [32, 1], strides = [1, 1]} : vector<32x9xf32> to vector<32x1xf32>
    %c240_i32_32 = arith.constant 240 : i32
    %105 = tpu.dynamic_rotate %33 by %c240_i32_32 dim 1 : vector<32x256xf32>, i32 -> vector<32x256xf32>
    %106 = vector.broadcast %104 : vector<32x1xf32> to vector<32x256xf32>
    %107 = arith.mulf %106, %105 : vector<32x256xf32>
    %108 = arith.addf %103, %107 : vector<32x256xf32>
    %109 = vector.extract_strided_slice %4 {offsets = [0, 8], sizes = [32, 1], strides = [1, 1]} : vector<32x9xf32> to vector<32x1xf32>
    %c239_i32 = arith.constant 239 : i32
    %110 = tpu.dynamic_rotate %72 by %c239_i32 dim 1 : vector<32x256xf32>, i32 -> vector<32x256xf32>
    %111 = vector.broadcast %109 : vector<32x1xf32> to vector<32x256xf32>
    %112 = arith.mulf %111, %110 : vector<32x256xf32>
    %113 = arith.addf %108, %112 : vector<32x256xf32>
    %cst_33 = arith.constant 0.000000e+00 : f32
    %114 = vector.shape_cast %28 : vector<1x256xi1> to vector<1x256xi1>
    %115 = vector.broadcast %114 : vector<1x256xi1> to vector<32x256xi1>
    %116 = vector.broadcast %cst_33 : f32 to vector<32x256xf32>
    %117 = arith.select %115, %86, %116 : vector<32x256xi1>, vector<32x256xf32>
    %118 = arith.addf %117, %99 : vector<32x256xf32>
    %cst_34 = arith.constant 0.000000e+00 : f32
    %119 = vector.shape_cast %30 : vector<1x256xi1> to vector<1x256xi1>
    %120 = vector.broadcast %119 : vector<1x256xi1> to vector<32x256xi1>
    %121 = vector.broadcast %cst_34 : f32 to vector<32x256xf32>
    %122 = arith.select %120, %113, %121 : vector<32x256xi1>, vector<32x256xf32>
    %123 = arith.addf %118, %122 : vector<32x256xf32>
    %124 = arith.addf %52, %64 : vector<32x1xf32>
    %125 = arith.addf %124, %5 : vector<32x1xf32>
    %cst_35 = arith.constant 0.000000e+00 : f32
    %126 = vector.broadcast %cst_35 : f32 to vector<32x1xf32>
    %127 = arith.subf %126, %125 : vector<32x1xf32>
    %128 = vector.broadcast %127 : vector<32x1xf32> to vector<32x256xf32>
    %129 = arith.subf %128, %123 : vector<32x256xf32>
    %130 = math.exp %129 : vector<32x256xf32>
    %cst_36 = arith.constant 1.000000e+00 : f32
    %131 = vector.broadcast %cst_36 : f32 to vector<32x256xf32>
    %132 = arith.addf %131, %130 : vector<32x256xf32>
    %133 = tpu.reciprocal %132 {approx = true} : vector<32x256xf32> -> vector<32x256xf32>
    %134 = arith.mulf %33, %133 : vector<32x256xf32>
    %135 = arith.index_cast %c0_i32_16 : i32 to index
    %c0_37 = arith.constant 0 : index
    %c0_38 = arith.constant 0 : index
    %136 = vector.load %arg8[%135, %c0_37, %c0_38] : memref<1x32x256xf32, #tpu.memory_space<vmem>>, vector<1x32x256xf32>
    %137 = vector.shape_cast %136 : vector<1x32x256xf32> to vector<32x256xf32>
    %138 = vector.shape_cast %134 : vector<32x256xf32> to vector<1x32x256xf32>
    tpu.vector_store %arg8[%135, %c0_37, %c0_38], %138 {strides = array<i32>} : memref<1x32x256xf32, #tpu.memory_space<vmem>>, vector<1x32x256xf32>,
    %c1_i32_39 = arith.constant 1 : i32
    return
  }
  func.func @transform_0(%arg0: i32) -> (i32, i32, i32) {
    %c0_i32 = arith.constant 0 : i32
    %c0_i32_0 = arith.constant 0 : i32
    %c0_i32_1 = arith.constant 0 : i32
    return %arg0, %c0_i32, %c0_i32_0 : i32, i32, i32
  }
  func.func @transform_1(%arg0: i32) -> (i32, i32) {
    %c0_i32 = arith.constant 0 : i32
    %c0_i32_0 = arith.constant 0 : i32
    %c0_i32_1 = arith.constant 0 : i32
    return %c0_i32, %c0_i32_0 : i32, i32
  }
  func.func @transform_2(%arg0: i32) -> (i32, i32) {
    %c0_i32 = arith.constant 0 : i32
    %c0_i32_0 = arith.constant 0 : i32
    %c0_i32_1 = arith.constant 0 : i32
    return %c0_i32, %c0_i32_0 : i32, i32
  }
  func.func @transform_3(%arg0: i32) -> (i32, i32) {
    %c0_i32 = arith.constant 0 : i32
    %c0_i32_0 = arith.constant 0 : i32
    %c0_i32_1 = arith.constant 0 : i32
    return %c0_i32, %c0_i32_0 : i32, i32
  }
  func.func @transform_4(%arg0: i32) -> (i32, i32) {
    %c0_i32 = arith.constant 0 : i32
    %c0_i32_0 = arith.constant 0 : i32
    %c0_i32_1 = arith.constant 0 : i32
    return %c0_i32, %c0_i32_0 : i32, i32
  }
  func.func @transform_5(%arg0: i32) -> (i32, i32) {
    %c0_i32 = arith.constant 0 : i32
    %c0_i32_0 = arith.constant 0 : i32
    %c0_i32_1 = arith.constant 0 : i32
    return %c0_i32, %c0_i32_0 : i32, i32
  }
  func.func @transform_6(%arg0: i32) -> (i32, i32) {
    %c0_i32 = arith.constant 0 : i32
    %c0_i32_0 = arith.constant 0 : i32
    %c0_i32_1 = arith.constant 0 : i32
    return %c0_i32, %c0_i32_0 : i32, i32
  }
  func.func @transform_7(%arg0: i32) -> (i32, i32, i32) {
    %c0_i32 = arith.constant 0 : i32
    %c0_i32_0 = arith.constant 0 : i32
    %c0_i32_1 = arith.constant 0 : i32
    return %arg0, %c0_i32, %c0_i32_0 : i32, i32, i32
  }
}

</mosaic_0001>

<bundles_post_ra>
// kernel: tpu_custom_call.1
= control target key start
LH: loop header
LB: loop body
LE: loop exit
PB: predicated region body
PF: predicated region fallthrough
CT: control target
= control target key end

     0   :  { %12 = vsyncpa [#allocation3], 0  ;;  %s2312_s0 = inlined_call_operand.vmem [shape: f32[2,32,256], index: 0, kind: input, shape index: {}]   ;;  %s2313_s1 = inlined_call_operand.vmem [shape: f32[32,2], index: 1, kind: input, shape index: {}]   ;;  %s2314_s2 = inlined_call_operand.vmem [shape: f32[1,2], index: 2, kind: input, shape index: {}]   ;;  %s2315_s3 = inlined_call_operand.vmem [shape: f32[32,2], index: 3, kind: input, shape index: {}]   ;;  %s2316_s4 = inlined_call_operand.vmem [shape: f32[32,1], index: 4, kind: input, shape index: {}]   ;;  %s2317_s5 = inlined_call_operand.vmem [shape: f32[32,9], index: 5, kind: input, shape index: {}]   ;;  %s2318_s6 = inlined_call_operand.vmem [shape: f32[32,1], index: 6, kind: input, shape index: {}]   ;;  %s2319_s7 = inlined_call_operand.hbm [shape: f32[2,32,256], index: 7, kind: output, shape index: {}]  }
   0x1   :  { %14 = vsyncpa [#allocation3 + $0x1], 0  ;;  %s1410_s24 = smov 0   ;;  %s1412_s25 = smov 0  }
   0x2   :  { %s1414_s26 = smov 0   ;;  %s1416_s27 = smov 0  }
   0x3 LB: > { %s1431_s28 = sadd.s32 4294967295, %s1349_s27   ;;  %s1155_s29 = sadd.s32 4294967294, %s1349_s27   ;;  %s1349_s27 = sphi %s1416_s27, %s2360_s27   ;;  %s1345_s26 = sphi %s1414_s26, %s2359_s26   ;;  %s1341_s25 = sphi %s1412_s25, %s2358_s25   ;;  %s1337_s24 = sphi %s1410_s24, %s2357_s24  }
   0x4   : > { %s1435_s30 = sadd.s32 1, %s1349_s27   ;;  %s179_s8 = sadd.s32 1, %s1345_s26 }
   0x5   : > { %s176_s9 = ssub.s32 %s1349_s27, %s1435_s30  ;;  %p189_p0 = scmp.ne.s32.totalorder %s1345_s26, %s1341_s25 }
   0x6   : > { %p177_p1 = scmp.eq.s32.totalorder %s176_s9, 0  ;;  %p190_p2 = scmp.eq.s32.totalorder %s1431_s28, 1 }
   0x7   : > { %p195_p3 = scmp.ne.s32.totalorder %s1341_s25, %s1337_s24  ;;  %p196_p4 = scmp.eq.s32.totalorder %s1155_s29, 1 }
   0x8   : > { %s1446_s10 = scalar_select %p177_p1, %s1345_s26, %s179_s8  }
   0x9   : > { %p1448_p5 = por %p190_p2, %p189_p0  ;;  %p1452_p6 = por %p196_p4, %p195_p3 }
   0xa   : > { %p1158_p7 = scmp.ge.s32.totalorder %s1349_s27, 1  ;;  %p240_p8 = scmp.lt.s32.totalorder %s1349_s27, 3 }
   0xc   : > { %p241_p9 = pnand %p1158_p7, %p240_p8 }
   0xe   : > { %244 = sbr.rel (%p241_p9) target bundleno = 646 (0x286), region = 48 }
  0x13   : > { %p272_p10 = scmp.lt.s32.totalorder %s1431_s28, 1  ;;  %v2321_v0 = vmov 0   ;;  %v1352_v1 = vmov 1   ;;  %v2320_v26 = vlaneseq  ;;  %s1353_s18 = smov 17   ;;  %v1558_v39 = vld [vmem:[%s2317_s5 + $0x8] sm:$0xff]  ;;  %v1566_v40 = vld [vmem:[%s2317_s5 + $0x10] sm:$0xff] }
  0x14   : > { %1226 = vset.pattern.permute.xlu1 %v2321_v0  ;;  %1228 = vset.pattern.permute.xlu0 %v1352_v1  ;;  %s1354_s21 = smov 16   ;;  %s1355_s29 = smov 15   ;;  %v1356_v44 = vmov 2   ;;  %v1608_v46 = vld [vmem:[%s2317_s5] sm:$0xff]  ;;  %v1629_v49 = vld [vmem:[%s2317_s5 + $0x18] sm:$0xff]  ;;  %v1358_v53 = vmov 3  }
  0x15   : > { %s273_s13 = scalar_select %p272_p10, %s1431_s28, 1  ;;  %v1516_v27 = vand.u32 127, %v2320_v26  ;;  %v1359_v55 = vmov 4   ;;  %v1361_v56 = vmov 5   ;;  %v1363_v61 = vmov 6  }
  0x16   : > { %s1357_s15 = smov 1   ;;  %s1360_s16 = smov 127   ;;  %vm419_vm9 = vcmask 15360  }
  0x17   : > { %s1167_s14 = sshll.u32 %s273_s13, 6  ;;  %v305_v28 = vand.u32 15, %v1516_v27  ;;  %v1520_v29 = vadd.s32 128, %v1516_v27  ;;  %vm499_vm4 = vcmp.lt.s32.totalorder %v1516_v27, 17  ;;  %vm552_vm5 = vcmp.lt.s32.totalorder %v1516_v27, 16  ;;  %s1366_s8 = smov 112  }
  0x18   : > { %s1465_s17 = scalar_lea.vmem %s2312_s0, %s1167_s14  ;;  %vm609_vm8 = vcmp.lt.s32.totalorder %v1516_v27, 15  ;;  %vm666_vm10 = vcmp.lt.s32.totalorder %v1516_v27, 1  ;;  %vm747_vm11 = vcmp.lt.s32.totalorder %v1516_v27, 127  ;;  %vm329_vm12 = vcmp.ge.s32.totalorder %v1516_v27, 16  ;;  %s1367_s14 = smov 111  }
  0x19   : > { %v1468_v2 = vld [vmem:[%s1465_s17 + $0x20] sm:$0xff]  ;;  %v1471_v3 = vld [vmem:[%s1465_s17 + $0x28] sm:$0xff]  ;;  %v1482_v7 = vld [vmem:[%s1465_s17 + $0x30] sm:$0xff]  ;;  %vm325_vm0 = vcmp.ne.s32.totalorder %v305_v28, 15  ;;  %2331 = vst [vmem:[#allocation5_spill] sm:$0xff] %v1520_v29  ;;  %v312_v31 = vand.u32 15, %v1520_v29 }
  0x1a   : > { %v1474_v4 = vld [vmem:[%s1465_s17] sm:$0xff]  ;;  %v347_v5 = vadd.f32 %v1471_v3, %v1468_v2  ;;  %v1479_v6 = vld [vmem:[%s1465_s17 + $0x8] sm:$0xff]  ;;  %v1485_v8 = vld [vmem:[%s1465_s17 + $0x38] sm:$0xff]  ;;  %v359_v19 = vmul.f32 %v1482_v7, %v1482_v7  ;;  %v357_v22 = vmul.f32 %v1468_v2, %v1468_v2  ;;  %v358_v23 = vmul.f32 %v1471_v3, %v1471_v3  ;;  %s269_s20 = sand.u32 1, %s1341_s25  }
  0x1b   : > { %v341_v9 = vadd.f32 %v1479_v6, %v1474_v4  ;;  %v1490_v10 = vld [vmem:[%s1465_s17 + $0x10] sm:$0xff]  ;;  %v1493_v11 = vld [vmem:[%s1465_s17 + $0x18] sm:$0xff]  ;;  %v350_v12 = vadd.f32 %v1485_v8, %v1482_v7  ;;  %v353_v16 = vmul.f32 %v1474_v4, %v1474_v4  ;;  %v354_v17 = vmul.f32 %v1479_v6, %v1479_v6  ;;  %s1159_s22 = sshll.u32 %s269_s20, 6 }
  0x1c   : > { %348 = vadd.xlane.f32.xlu1 %v347_v5  ;;  %v355_v13 = vmul.f32 %v1490_v10, %v1490_v10  ;;  %v356_v14 = vmul.f32 %v1493_v11, %v1493_v11  ;;  %v344_v15 = vadd.f32 %v1493_v11, %v1490_v10  ;;  %v360_v20 = vmul.f32 %v1485_v8, %v1485_v8  ;;  %s2242_s23 = scalar_lea.vmem [#allocation2], %s1159_s22 }
  0x1d   : > { %342 = vadd.xlane.f32.xlu0 %v341_v9  ;;  %v361_v21 = vadd.f32 %v354_v17, %v353_v16  ;;  %v367_v25 = vadd.f32 %v358_v23, %v357_v22  ;;  %v1523_v30 = vsel %vm325_vm0, %v1490_v10, 0.0  ;;  %v1528_v32 = vsel %vm325_vm0, %v1468_v2, 0.0 }
  0x1e   : > { %v364_v18 = vadd.f32 %v356_v14, %v355_v13  ;;  %v370_v24 = vadd.f32 %v360_v20, %v359_v19  ;;  %v1531_v33 = vsel %vm325_vm0, %v1474_v4, 0.0  ;;  %vm326_vm1 = vcmp.ne.s32.totalorder %v312_v31, 15 }
  0x1f   : > { %v1535_v34 = vsel %vm325_vm0, %v1482_v7, 0.0  ;;  %v1539_v35 = vsel %vm326_vm1, %v1479_v6, 0.0  ;;  %v1543_v36 = vsel %vm326_vm1, %v1493_v11, 0.0  ;;  %v1547_v37 = vsel %vm326_vm1, %v1471_v3, 0.0 }
  0x20   : > { %351 = vadd.xlane.f32.xlu1 %v350_v12  ;;  %v1551_v38 = vsel %vm326_vm1, %v1485_v8, 0.0  ;;  %vm1580_vm2 = vcmp.ne.s32.totalorder %v305_v28, 0  ;;  %vm1601_vm3 = vcmp.ne.s32.totalorder %v312_v31, 0  ;;  %v1364_v31 = vmov 7  }
  0x21   : > { %345 = vadd.xlane.f32.xlu0 %v344_v15  ;;  %v1588_v42 = vsel %vm1580_vm2, %v1474_v4, 0.0  ;;  %v1597_v43 = vsel %vm1580_vm2, %v1468_v2, 0.0  ;;  %v1615_v47 = vsel %vm1601_vm3, %v1479_v6, 0.0  ;;  %v1623_v48 = vsel %vm1601_vm3, %v1471_v3, 0.0 }
  0x22   : > { %v1637_v50 = vsel %vm1580_vm2, %v1490_v10, 0.0  ;;  %v1645_v51 = vsel %vm1580_vm2, %v1482_v7, 0.0  ;;  %v1653_v52 = vsel %vm1601_vm3, %v1493_v11, 0.0  ;;  %v1661_v54 = vsel %vm1601_vm3, %v1485_v8, 0.0 }
  0x23   : > { %vm804_vm13 = vcmp.lt.s32.totalorder %v1516_v27, 113  ;;  %vm853_vm14 = vcmp.lt.s32.totalorder %v1516_v27, 112  ;;  %vm910_vm15 = vcmp.lt.s32.totalorder %v1516_v27, 111 }
  0x24   : > { %365 = vadd.xlane.f32.xlu1 %v364_v18 }
  0x25   : > { %362 = vadd.xlane.f32.xlu0 %v361_v21 }
  0x28   : > { %371 = vadd.xlane.f32.xlu1 %v370_v24 }
  0x29   : > { %368 = vadd.xlane.f32.xlu0 %v367_v25 }
  0x39   : > { %485 = vrot.lane.b32.xlu1 %v1523_v30, %s1353_s18 }
  0x3d   : > { %487 = vrot.lane.b32.xlu1 %v1528_v32, %s1353_s18 }
  0x3f   : > { %483 = vrot.lane.b32.xlu0 %v1531_v33, %s1353_s18 }
  0x41   : > { %489 = vrot.lane.b32.xlu1 %v1535_v34, %s1353_s18 }
  0x43   : > { %491 = vrot.lane.b32.xlu0 %v1539_v35, %s1353_s18 }
  0x45   : > { %493 = vrot.lane.b32.xlu1 %v1543_v36, %s1353_s18 }
  0x47   : > { %495 = vrot.lane.b32.xlu0 %v1547_v37, %s1353_s18 }
  0x49   : > { %497 = vrot.lane.b32.xlu1 %v1551_v38, %s1353_s18  ;;  %s1362_s18 = smov 113  }
  0x4b   : > { %538 = vrot.lane.b32.xlu0 %v1490_v10, %s1354_s21 }
  0x4d   : > { %515 = vperm.xlu1 %1226, %v1558_v39  }
  0x4f   : > { %542 = vrot.lane.b32.xlu0 %v1482_v7, %s1354_s21 }
  0x51   : > { %520 = vperm.xlu1 %1226, %v1566_v40  }
  0x53   : > { %546 = vrot.lane.b32.xlu0 %v1493_v11, %s1354_s21 }
  0x55   : > { %536 = vrot.lane.b32.xlu1 %v1474_v4, %s1354_s21 }
  0x56   : > { %1227 = vset.pattern.permute.xlu1 %v1352_v1 }
  0x57   : > { %550 = vrot.lane.b32.xlu0 %v1485_v8, %s1354_s21 }
  0x59   : > { %540 = vrot.lane.b32.xlu1 %v1468_v2, %s1354_s21 }
  0x5b   : > { %566 = vperm.xlu0 %1228, %v1558_v39  }
  0x5d   : > { %544 = vrot.lane.b32.xlu1 %v1479_v6, %s1354_s21 }
  0x5f   : > { %593 = vrot.lane.b32.xlu0 %v1588_v42, %s1355_s29 }
  0x60   : > { %1229 = vset.pattern.permute.xlu0 %v1356_v44 }
  0x61   : > { %548 = vrot.lane.b32.xlu1 %v1471_v3, %s1354_s21 }
  0x63   : > { %597 = vrot.lane.b32.xlu0 %v1597_v43, %s1355_s29 }
  0x65   : > { %562 = vperm.xlu1 %1227, %v1608_v46  }
  0x67   : > { %601 = vrot.lane.b32.xlu0 %v1615_v47, %s1355_s29 }
  0x69   : > { %570 = vperm.xlu1 %1227, %v1566_v40  }
  0x6b   : > { %605 = vrot.lane.b32.xlu0 %v1623_v48, %s1355_s29 }
  0x6d   : > { %574 = vperm.xlu1 %1227, %v1629_v49  }
  0x6f   : > { %619 = vperm.xlu0 %1229, %v1608_v46  }
  0x71   : > { %595 = vrot.lane.b32.xlu1 %v1637_v50, %s1355_s29 }
  0x72   : > { %1230 = vset.pattern.permute.xlu1 %v1356_v44 }
  0x73   : > { %631 = vperm.xlu0 %1229, %v1629_v49  }
  0x75   : > { %599 = vrot.lane.b32.xlu1 %v1645_v51, %s1355_s29 }
  0x77   : > { %652 = vrot.lane.b32.xlu0 %v1523_v30, %s1357_s15 }
  0x78   : > { %1232 = vset.pattern.permute.xlu0 %v1358_v53 }
  0x79   : > { %603 = vrot.lane.b32.xlu1 %v1653_v52, %s1355_s29 }
  0x7b   : > { %656 = vrot.lane.b32.xlu0 %v1535_v34, %s1357_s15 }
  0x7d   : > { %607 = vrot.lane.b32.xlu1 %v1661_v54, %s1355_s29  ;;  %s1168_s29 = sshll.u32 %s1431_s28, 10  ;;  %s2271_s28 = scalar_lea.sflag [#allocation3], %s269_s20 }
  0x7f   : > { %660 = vrot.lane.b32.xlu0 %v1543_v36, %s1357_s15 }
  0x81   : > { %623 = vperm.xlu1 %1230, %v1558_v39  }
  0x83   : > { %664 = vrot.lane.b32.xlu0 %v1551_v38, %s1357_s15 }
  0x85   : > { %627 = vperm.xlu1 %1230, %v1566_v40  }
  0x87   : > { %680 = vperm.xlu0 %1232, %v1558_v39  }
  0x89   : > { %650 = vrot.lane.b32.xlu1 %v1531_v33, %s1357_s15 }
  0x8a   : > { %1231 = vset.pattern.permute.xlu1 %v1358_v53 }
  0x8b   : > { %1233 = vset.pattern.permute.xlu0 %v1359_v55 }
  0x8c   : > { %700 = vperm.xlu0 %1233, %v1608_v46  }
  0x8d   : > { %654 = vrot.lane.b32.xlu1 %v1528_v32, %s1357_s15 }
  0x90   : > { %712 = vperm.xlu0 %1233, %v1629_v49  }
  0x91   : > { %658 = vrot.lane.b32.xlu1 %v1539_v35, %s1357_s15 }
  0x94   : > { %733 = vrot.lane.b32.xlu0 %v1637_v50, %s1360_s16 }
  0x95   : > { %662 = vrot.lane.b32.xlu1 %v1547_v37, %s1357_s15  ;;  %1236 = vset.pattern.permute.xlu0 %v1361_v56  ;;  %s1368_s15 = smov [#allocation2]  }
  0x98   : > { %737 = vrot.lane.b32.xlu0 %v1645_v51, %s1360_s16 }
  0x99   : > { %676 = vperm.xlu1 %1231, %v1608_v46  }
  0x9c   : > { %741 = vrot.lane.b32.xlu0 %v1653_v52, %s1360_s16 }
  0x9d   : > { %684 = vperm.xlu1 %1231, %v1566_v40  }
  0xa0   : > { %745 = vrot.lane.b32.xlu0 %v1661_v54, %s1360_s16 }
  0xa1   : > { %688 = vperm.xlu1 %1231, %v1629_v49  }
  0xa4   : > { %761 = vperm.xlu0 %1236, %v1558_v39  }
  0xa5   : > { %v349_v57 = vpop.xlane.xlu1 %348  ;;  %1234 = vset.pattern.permute.xlu1 %v1359_v55 }
  0xa6   : > { %v343_v58 = vpop.xlane.xlu0 %342  ;;  %704 = vperm.xlu1 %1234, %v1558_v39   ;;  %v375_v5 = vmul.f32 %v349_v57, %v349_v57 }
  0xa7   : > { %v373_v59 = vmul.f32 %v343_v58, %v343_v58  ;;  %v1365_v58 = vmov 8  }
  0xa8   : > { %788 = vrot.lane.b32.xlu0 %v1531_v33, %s1362_s18  ;;  %v379_v18 = vmul.f32 0.00390625, %v375_v5 }
  0xa9   : > { %v352_v60 = vpop.xlane.xlu1 %351  ;;  %1237 = vset.pattern.permute.xlu0 %v1363_v61  ;;  %v377_v9 = vmul.f32 0.00390625, %v373_v59 }
  0xaa   : > { %v346_v62 = vpop.xlane.xlu0 %345  ;;  %708 = vperm.xlu1 %1234, %v1566_v40   ;;  %v376_v1 = vmul.f32 %v352_v60, %v352_v60 }
  0xab   : > { %v374_v63 = vmul.f32 %v346_v62, %v346_v62 }
  0xac   : > { %814 = vperm.xlu0 %1237, %v1608_v46   ;;  %v380_v17 = vmul.f32 0.00390625, %v376_v1 }
  0xad   : > { %v378_v12 = vmul.f32 0.00390625, %v374_v63  ;;  %v366_v13 = vpop.xlane.xlu1 %365 }
  0xae   : > { %v363_v14 = vpop.xlane.xlu0 %362  ;;  %731 = vrot.lane.b32.xlu1 %v1588_v42, %s1360_s16 }
  0xaf   : > { %v382_v15 = vsub.f32 %v366_v13, %v378_v12  ;;  %v381_v16 = vsub.f32 %v363_v14, %v377_v9  ;;  %1235 = vset.pattern.permute.xlu1 %v1361_v56 }
  0xb0   : > { %826 = vperm.xlu0 %1237, %v1629_v49  }
  0xb1   : > { %v1698_v19 = vmul.f32 0.003921569, %v382_v15  ;;  %v1700_v20 = vmul.f32 0.003921569, %v381_v16  ;;  %v372_v21 = vpop.xlane.xlu1 %371 }
  0xb2   : > { %v384_v22 = vsub.f32 %v372_v21, %v380_v17  ;;  %v369_v23 = vpop.xlane.xlu0 %368  ;;  %735 = vrot.lane.b32.xlu1 %v1597_v43, %s1360_s16 }
  0xb3   : > { %v390_v24 = vmul.f32 %v1698_v19, %v1698_v19  ;;  %v389_v25 = vmul.f32 %v1700_v20, %v1700_v20  ;;  %v383_v28 = vsub.f32 %v369_v23, %v379_v18 }
  0xb4   : > { %1240 = vset.pattern.permute.xlu0 %v1364_v31  ;;  %v1708_v33 = vmul.f32 0.003921569, %v384_v22 }
  0xb5   : > { %v1710_v41 = vmul.f32 0.003921569, %v383_v28  ;;  %867 = vperm.xlu0 %1240, %v1558_v39   ;;  %v1713_v44 = vpop.permute.xlu1 %485  ;;  %v393_v53 = vadd.f32 %v390_v24, %v389_v25 }
  0xb6   : > { %v484_v45 = vpop.permute.xlu0 %483  ;;  %739 = vrot.lane.b32.xlu1 %v1615_v47, %s1360_s16  ;;  %v392_v56 = vmul.f32 %v1708_v33, %v1708_v33 }
  0xb7   : > { %v391_v55 = vmul.f32 %v1710_v41, %v1710_v41 }
  0xb9   : > { %v394_v57 = vadd.f32 %v393_v53, %v391_v55  ;;  %1241 = vset.pattern.permute.xlu0 %v1365_v58  ;;  %v1722_v59 = vpop.permute.xlu1 %487 }
  0xba   : > { %920 = vperm.xlu0 %1241, %v1608_v46   ;;  %v492_v60 = vpop.permute.xlu0 %491  ;;  %743 = vrot.lane.b32.xlu1 %v1623_v48, %s1360_s16  ;;  %s1293_s16 = sshll.u32 %s1368_s15, 4  ;;  %s1294_s16 = int_to_ptr.vmem [resolvable:$false] %s1293_s16 }
  0xbb   : > { %v395_v62 = vadd.f32 %v394_v57, %v392_v56  ;;  %v1730_v63 = vsel %vm499_vm4, %v484_v45, %v492_v60  ;;  %v1734_v1 = vsel %vm499_vm4, %v492_v60, %v484_v45 }
  0xbd   : > { %v396_v5 = vrot.slane %v395_v62, 4  ;;  %v1736_v9 = vpop.permute.xlu1 %489 }
  0xbe   : > { %2336 = vst [vmem:[#allocation6_spill] sm:$0xff] %v1736_v9  ;;  %932 = vperm.xlu0 %1241, %v1629_v49   ;;  %v496_v12 = vpop.permute.xlu0 %495  ;;  %757 = vperm.xlu1 %1235, %v1608_v46  }
  0xbf   : > { %v397_v13 = vadd.f32 %v396_v5, %v395_v62 }
  0xc1   : > { %v398_v14 = vrot.slane %v397_v13, 2  ;;  %v1740_v15 = vpop.permute.xlu1 %493 }
  0xc2   : > { %1243 = vset.pattern.permute.xlu0 %v2321_v0  ;;  %765 = vperm.xlu1 %1235, %v1566_v40   ;;  %v539_v16 = vpop.permute.xlu0 %538 }
  0xc3   : > { %v399_v17 = vadd.f32 %v398_v14, %v397_v13  ;;  %510 = vperm.xlu0 %1243, %v1608_v46  }
  0xc5   : > { %v400_v18 = vrot.slane %v399_v17, 1  ;;  %v1745_v21 = vpop.permute.xlu1 %497 }
  0xc6   : > { %2337 = vst [vmem:[#allocation7_spill] sm:$0xff] %v1745_v21  ;;  %769 = vperm.xlu1 %1235, %v1629_v49   ;;  %v543_v22 = vpop.permute.xlu0 %542  ;;  %v2346_v21 = vlaneseq }
  0xc7   : > { %v401_v23 = vadd.f32 %v400_v18, %v399_v17 }
  0xc9   : > { %1245 = vrsqrt.f32 %v401_v23  ;;  %v1749_v24 = vpop.permute.xlu1 %515  ;;  %vm404_vm6 = vcmp.eq.f32.partialorder %v401_v23, inf  ;;  %vm406_vm7 = vcmp.eq.f32.partialorder %v401_v23, 0.0 }
  0xca   : > { %790 = vrot.lane.b32.xlu1 %v1523_v30, %s1362_s18  ;;  %v547_v25 = vpop.permute.xlu0 %546 }
  0xcb   : > { %1238 = vset.pattern.permute.xlu1 %v1363_v61  ;;  %v554_v28 = vsel %vm552_vm5, %v539_v16, %v547_v25  ;;  %v558_v45 = vsel %vm552_vm5, %v547_v25, %v539_v16  ;;  %v407_v16 = vand.u32 2147483648, %v401_v23 }
  0xcd   : > { %v521_v53 = vpop.permute.xlu1 %520 }
  0xce   : > { %818 = vperm.xlu1 %1238, %v1558_v39   ;;  %v551_v55 = vpop.permute.xlu0 %550 }
  0xcf   : > { %v556_v56 = vsel %vm552_vm5, %v543_v22, %v551_v55  ;;  %v560_v57 = vsel %vm552_vm5, %v551_v55, %v543_v22 }
  0xd1   : > { %v1763_v30 = vpop.permute.xlu1 %536 }
  0xd2   : > { %822 = vperm.xlu1 %1238, %v1566_v40  }
  0xd5   : > { %v541_v61 = vpop.permute.xlu1 %540 }
  0xd6   : > { %v1246_v60 = vpop.eup %1245  ;;  %v567_v62 = vpop.permute.xlu0 %566  ;;  %1239 = vset.pattern.permute.xlu1 %v1364_v31 }
  0xd7   : > { %v403_v5 = vmul.f32 %v1246_v60, %v401_v23  ;;  %v1766_v13 = vmul.f32 %v567_v62, %v558_v45  ;;  %v1768_v14 = vmul.f32 %v567_v62, %v554_v28  ;;  %863 = vperm.xlu1 %1239, %v1608_v46   ;;  %v502_v62 = vsel %vm499_vm4, %v1722_v59, %v496_v12 }
  0xd9   : > { %v405_v17 = vsel %vm404_vm6, %v401_v23, %v403_v5  ;;  %v1771_v18 = vpop.permute.xlu1 %544  ;;  %v506_v5 = vsel %vm499_vm4, %v496_v12, %v1722_v59 }
  0xda   : > { %v408_v22 = vsel %vm406_vm7, %v407_v16, %v405_v17  ;;  %v594_v25 = vpop.permute.xlu0 %593 }
  0xdb   : > { %v409_v55 = vmax.f32 %v408_v22, 1e-12  ;;  %871 = vperm.xlu1 %1239, %v1566_v40   ;;  %v532_v22 = vmul.f32 %v521_v53, %v506_v5 }
  0xdd   : > { %1247 = vrcp.f32 %v409_v55  ;;  %v549_v31 = vpop.permute.xlu1 %548  ;;  %v533_v55 = vmul.f32 %v521_v53, %v502_v62  ;;  %v277_v53 = vld [vmem:[%s2313_s1] sm:$0xff]  ;;  %v278_v62 = vld [vmem:[%s2313_s1 + $0x8] sm:$0xff] }
  0xde   : > { %v598_v60 = vpop.permute.xlu0 %597  ;;  %v555_v16 = vsel %vm552_vm5, %v541_v61, %v549_v31 }
  0xdf   : > { %875 = vperm.xlu1 %1239, %v1629_v49  }
  0xe1   : > { %v1775_v28 = vpop.permute.xlu1 %562 }
  0xe2   : > { %v602_v46 = vpop.permute.xlu0 %601 }
  0xe3   : > { %1242 = vset.pattern.permute.xlu1 %v1365_v58  ;;  %v610_v23 = vsel %vm609_vm8, %v594_v25, %v602_v46  ;;  %v614_v45 = vsel %vm609_vm8, %v602_v46, %v594_v25  ;;  %v559_v58 = vsel %vm552_vm5, %v549_v31, %v541_v61 }
  0xe4   : > { %924 = vperm.xlu1 %1242, %v1558_v39  }
  0xe5   : > { %v571_v17 = vpop.permute.xlu1 %570 }
  0xe6   : > { %v581_v25 = vmul.f32 %v571_v17, %v559_v58  ;;  %v582_v46 = vmul.f32 %v571_v17, %v555_v16  ;;  %v606_v39 = vpop.permute.xlu0 %605 }
  0xe7   : > { %v1796_v26 = vsel %vm609_vm8, %v598_v60, %v606_v39  ;;  %v1800_v0 = vsel %vm609_vm8, %v606_v39, %v598_v60  ;;  %v279_v60 = vld [vmem:[%s2313_s1 + $0x10] sm:$0xff] }
  0xe8   : > { %v1802_v59 = vadd.f32 %v581_v25, %v532_v22  ;;  %v1804_v12 = vadd.f32 %v582_v46, %v533_v55  ;;  %928 = vperm.xlu1 %1242, %v1566_v40  }
  0xe9   : > { %v575_v61 = vpop.permute.xlu1 %574 }
  0xea   : > { %v1248_v31 = vpop.eup %1247  ;;  %v1816_v5 = vmul.f32 %v575_v61, %v560_v57  ;;  %v1818_v16 = vmul.f32 %v575_v61, %v556_v56  ;;  %v620_v58 = vpop.permute.xlu0 %619  ;;  %v280_v57 = vld [vmem:[%s2313_s1 + $0x18] sm:$0xff] }
  0xeb   : > { %v1821_v40 = vmul.f32 %v1248_v31, %v1700_v20  ;;  %v1824_v17 = vmul.f32 %v1248_v31, %v1698_v19  ;;  %v1827_v22 = vmul.f32 %v1248_v31, %v1710_v41  ;;  %v1830_v55 = vmul.f32 %v1248_v31, %v1708_v33 }
  0xec   : > { %2338 = vst [vmem:[#allocation8_spill] sm:$0xff] %v1816_v5  ;;  %2339 = vst [vmem:[#allocation9_spill] sm:$0xff] %v1818_v16  ;;  %v1835_v56 = vmul.f32 %v620_v58, %v614_v45  ;;  %v1837_v25 = vmul.f32 %v620_v58, %v610_v23  ;;  %v2343_v20 = vmov 0  }
  0xed   : > { %2340 = vst [vmem:[#allocation10_spill] sm:$0xff] %v1824_v17  ;;  %2341 = vst [vmem:[#allocation11_spill] sm:$0xff] %v1827_v22  ;;  %1244 = vset.pattern.permute.xlu1 %v2343_v20  ;;  %v415_v19 = vmul.f32 %v1821_v40, %v277_v53  ;;  %v416_v46 = vmul.f32 %v1824_v17, %v278_v62  ;;  %v417_v41 = vmul.f32 %v1827_v22, %v279_v60  ;;  %v596_v39 = vpop.permute.xlu1 %595 }
  0xee   : > { %2342 = vst [vmem:[#allocation12_spill] sm:$0xff] %v1830_v55  ;;  %v632_v33 = vpop.permute.xlu0 %631  ;;  %v418_v61 = vmul.f32 %v1830_v55, %v280_v57  ;;  %v436_v22 = vshrl.u32 %v2346_v21, 7 }
  0xef   : > { %v420_v31 = vsel %vm419_vm9, %v415_v19, 0.0  ;;  %v421_v29 = vsel %vm419_vm9, %v416_v46, 0.0  ;;  %v423_v23 = vsel %vm419_vm9, %v417_v41, 0.0 }
  0xf0   : > { %v422_v45 = vadd.f32 %v421_v29, %v420_v31  ;;  %v425_v53 = vsel %vm419_vm9, %v418_v61, 0.0  ;;  %v501_v29 = vsel %vm499_vm4, %v1713_v44, %v1740_v15 }
  0xf1   : > { %v600_v58 = vpop.permute.xlu1 %599 }
  0xf2   : > { %v424_v16 = vadd.f32 %v423_v23, %v422_v45  ;;  %v653_v20 = vpop.permute.xlu0 %652 }
  0xf4   : > { %v426_v5 = vadd.f32 %v425_v53, %v424_v16  ;;  %v505_v16 = vsel %vm499_vm4, %v1740_v15, %v1713_v44  ;;  %v531_v53 = vmul.f32 %v1749_v24, %v501_v29 }
  0xf5   : > { %v604_v62 = vpop.permute.xlu1 %603  ;;  %v530_v61 = vmul.f32 %v1749_v24, %v505_v16  ;;  %v281_v24 = vld [vmem:[%s2314_s2] sm:$0x1] }
  0xf6   : > { %v427_v9 = vrot.slane %v426_v5, 4  ;;  %v611_v60 = vsel %vm609_vm8, %v596_v39, %v604_v62  ;;  %v615_v57 = vsel %vm609_vm8, %v604_v62, %v596_v39  ;;  %v657_v19 = vpop.permute.xlu0 %656 }
  0xf7   : > { %v587_v62 = vadd.f32 %v1766_v13, %v530_v61  ;;  %v437_v61 = vsub.s32 0, %v436_v22 }
  0xf8   : > { %v428_v55 = vadd.f32 %v427_v9, %v426_v5 }
  0xf9   : > { %v608_v46 = vpop.permute.xlu1 %607 }
  0xfa   : > { %v429_v41 = vrot.slane %v428_v55, 2  ;;  %v613_v39 = vsel %vm609_vm8, %v600_v58, %v608_v46  ;;  %v617_v9 = vsel %vm609_vm8, %v608_v46, %v600_v58  ;;  %v661_v5 = vpop.permute.xlu0 %660  ;;  %v588_v46 = vadd.f32 %v1768_v14, %v531_v53 }
  0xfb   : > { %v1866_v31 = vmul.f32 %v632_v33, %v617_v9  ;;  %v1868_v45 = vmul.f32 %v632_v33, %v613_v39  ;;  %v668_v44 = vsel %vm666_vm10, %v653_v20, %v661_v5  ;;  %v672_v15 = vsel %vm666_vm10, %v661_v5, %v653_v20 }
  0xfc   : > { %v430_v23 = vadd.f32 %v429_v41, %v428_v55 }
  0xfd   : > { %2344 = vst [vmem:[#allocation13_spill] sm:$0xff] %v1866_v31  ;;  %2345 = vst [vmem:[#allocation14_spill] sm:$0xff] %v1868_v45  ;;  %v624_v16 = vpop.permute.xlu1 %623 }
  0xfe   : > { %v431_v58 = vrot.slane %v430_v23, 1  ;;  %v636_v9 = vmul.f32 %v624_v16, %v615_v57  ;;  %v637_v33 = vmul.f32 %v624_v16, %v611_v60  ;;  %v665_v39 = vpop.permute.xlu0 %664 }
  0xff   : > { %v1880_v45 = vsel %vm666_vm10, %v657_v19, %v665_v39  ;;  %v674_v55 = vsel %vm666_vm10, %v665_v39, %v657_v19 }
 0x100   : > { %v1887_v13 = vadd.f32 %v636_v9, %v587_v62  ;;  %v1889_v21 = vadd.f32 %v637_v33, %v588_v46  ;;  %v432_v20 = vadd.f32 %v431_v58, %v430_v23 }
 0x101   : > { %v628_v14 = vpop.permute.xlu1 %627 }
 0x102   : > { %v638_v60 = vmul.f32 %v628_v14, %v1800_v0  ;;  %v639_v57 = vmul.f32 %v628_v14, %v1796_v26  ;;  %v681_v29 = vpop.permute.xlu0 %680  ;;  %v433_v41 = vadd.f32 %v432_v20, %v281_v24  ;;  %v282_v0 = vld [vmem:[%s2315_s3] sm:$0xff]  ;;  %v283_v26 = vld [vmem:[%s2315_s3 + $0x8] sm:$0xff] }
 0x103   : > { %v1893_v5 = vmul.f32 %v681_v29, %v672_v15  ;;  %v1895_v19 = vmul.f32 %v681_v29, %v668_v44 }
 0x104   : > { %v1898_v53 = vadd.f32 %v638_v60, %v1802_v59  ;;  %v1901_v62 = vadd.f32 %v639_v57, %v1804_v12  ;;  %v434_v16 = vmax.f32 %v433_v41, 0.0  ;;  %v284_v59 = vld [vmem:[%s2315_s3 + $0x10] sm:$0xff] }
 0x105   : > { %v651_v23 = vpop.permute.xlu1 %650 }
 0x106   : > { %v1909_v22 = vrot.slane %v434_v16, %v437_v61 }
 0x107   : > { %v701_v44 = vpop.permute.xlu0 %700 }
 0x108   : > { %v439_v12 = vmul.f32 %v1909_v22, %v282_v0  ;;  %v440_v15 = vmul.f32 %v1909_v22, %v283_v26  ;;  %v441_v9 = vmul.f32 %v1909_v22, %v284_v59  ;;  %v715_v0 = vmul.f32 %v701_v44, %v1474_v4 }
 0x109   : > { %v655_v58 = vpop.permute.xlu1 %654  ;;  %v716_v26 = vmul.f32 %v701_v44, %v1479_v6 }
 0x10a   : > { %v443_v46 = vsel %vm419_vm9, %v439_v12, 0.0  ;;  %v446_v33 = vsel %vm419_vm9, %v440_v15, 0.0  ;;  %v449_v60 = vsel %vm419_vm9, %v441_v9, 0.0 }
 0x10b   : > { %444 = vadd.xlane.f32.xlu0 %v443_v46  ;;  %v713_v39 = vpop.permute.xlu0 %712 }
 0x10c   : > { %447 = vadd.xlane.f32.xlu1 %v446_v33  ;;  %v721_v44 = vmul.f32 %v713_v39, %v1482_v7  ;;  %v722_v17 = vmul.f32 %v713_v39, %v1485_v8 }
 0x10d   : > { %v659_v24 = vpop.permute.xlu1 %658 }
 0x10e   : > { %v667_v20 = vsel %vm666_vm10, %v651_v23, %v659_v24  ;;  %v671_v14 = vsel %vm666_vm10, %v659_v24, %v651_v23 }
 0x10f   : > { %450 = vadd.xlane.f32.xlu0 %v449_v60  ;;  %v734_v57 = vpop.permute.xlu0 %733 }
 0x111   : > { %v663_v29 = vpop.permute.xlu1 %662 }
 0x112   : > { %v669_v41 = vsel %vm666_vm10, %v655_v58, %v663_v29  ;;  %v673_v61 = vsel %vm666_vm10, %v663_v29, %v655_v58 }
 0x113   : > { %v738_v16 = vpop.permute.xlu0 %737 }
 0x115   : > { %v677_v59 = vpop.permute.xlu1 %676 }
 0x116   : > { %v691_v23 = vmul.f32 %v677_v59, %v671_v14  ;;  %v692_v12 = vmul.f32 %v677_v59, %v667_v20 }
 0x117   : > { %v742_v15 = vpop.permute.xlu0 %741 }
 0x118   : > { %v723_v46 = vadd.f32 %v715_v0, %v691_v23  ;;  %v724_v9 = vadd.f32 %v716_v26, %v692_v12  ;;  %v749_v33 = vsel %vm747_vm11, %v734_v57, %v742_v15  ;;  %v753_v24 = vsel %vm747_vm11, %v742_v15, %v734_v57 }
 0x119   : > { %v685_v58 = vpop.permute.xlu1 %684 }
 0x11a   : > { %v695_v60 = vmul.f32 %v685_v58, %v673_v61  ;;  %v696_v29 = vmul.f32 %v685_v58, %v669_v41 }
 0x11b   : > { %v746_v31 = vpop.permute.xlu0 %745 }
 0x11c   : > { %v1939_v20 = vsel %vm747_vm11, %v738_v16, %v746_v31  ;;  %v1943_v14 = vsel %vm747_vm11, %v746_v31, %v738_v16 }
 0x11d   : > { %v689_v0 = vpop.permute.xlu1 %688  ;;  %792 = vrot.lane.b32.xlu1 %v1528_v32, %s1362_s18 }
 0x11e   : > { %v697_v57 = vmul.f32 %v689_v0, %v674_v55  ;;  %v698_v41 = vmul.f32 %v689_v0, %v1880_v45 }
 0x11f   : > { %v762_v61 = vpop.permute.xlu0 %761 }
 0x120   : > { %v1948_v26 = vadd.f32 %v721_v44, %v697_v57  ;;  %v1950_v59 = vadd.f32 %v722_v17, %v698_v41  ;;  %v774_v39 = vmul.f32 %v762_v61, %v749_v33  ;;  %v775_v23 = vmul.f32 %v762_v61, %v753_v24 }
 0x121   : > { %v705_v12 = vpop.permute.xlu1 %704  ;;  %796 = vrot.lane.b32.xlu1 %v1539_v35, %s1362_s18  ;;  %v957_v44 = vsel %vm329_vm12, %v1887_v13, 0.0 }
 0x122   : > { %v717_v31 = vmul.f32 %v705_v12, %v1490_v10  ;;  %v718_v16 = vmul.f32 %v705_v12, %v1493_v11 }
 0x123   : > { %v1956_v15 = vpop.permute.xlu0 %788 }
 0x124   : > { %v725_v32 = vadd.f32 %v717_v31, %v1893_v5  ;;  %v726_v45 = vadd.f32 %v718_v16, %v1895_v19 }
 0x125   : > { %525 = vperm.xlu0 %1243, %v1629_v49   ;;  %v709_v17 = vpop.permute.xlu1 %708 }
 0x126   : > { %v782_v55 = vadd.f32 %v774_v39, %v725_v32  ;;  %v783_v33 = vadd.f32 %v775_v23, %v726_v45  ;;  %v719_v24 = vmul.f32 %v709_v17, %v1468_v2  ;;  %v720_v35 = vmul.f32 %v709_v17, %v1471_v3 }
 0x127   : > { %v1964_v58 = vpop.permute.xlu0 %814 }
 0x128   : > { %v727_v0 = vadd.f32 %v719_v24, %v695_v60  ;;  %v728_v57 = vadd.f32 %v720_v35, %v696_v29  ;;  %v1969_v5 = vadd.f32 %v957_v44, %v782_v55  ;;  %v1972_v19 = vadd.f32 %v783_v33, %v1889_v21 }
 0x129   : > { %v732_v49 = vpop.permute.xlu1 %731  ;;  %794 = vrot.lane.b32.xlu0 %v1535_v34, %s1362_s18  ;;  %v553_v55 = vsel %vm552_vm5, %v1763_v30, %v1771_v18 }
 0x12a   : > { %v578_v35 = vmul.f32 %v1775_v28, %v553_v55  ;;  %v2348_v55 = vld [vmem:[#allocation11_spill] sm:$0xff] }
 0x12b   : > { %v1976_v41 = vpop.permute.xlu0 %826 }
 0x12d   : > { %v736_v61 = vpop.permute.xlu1 %735  ;;  %798 = vrot.lane.b32.xlu0 %v1543_v36, %s1362_s18 }
 0x130   : > { %v1980_v39 = vpop.permute.xlu0 %867 }
 0x131   : > { %v740_v13 = vpop.permute.xlu1 %739  ;;  %802 = vrot.lane.b32.xlu0 %v1551_v38, %s1362_s18 }
 0x132   : > { %v748_v21 = vsel %vm747_vm11, %v732_v49, %v740_v13  ;;  %v752_v60 = vsel %vm747_vm11, %v740_v13, %v732_v49 }
 0x135   : > { %v744_v29 = vpop.permute.xlu1 %743  ;;  %v1988_v34 = vpop.permute.xlu0 %920  ;;  %839 = vrot.lane.b32.xlu0 %v1490_v10, %s1366_s8  ;;  %v285_v10 = vld [vmem:[%s2315_s3 + $0x18] sm:$0xff] }
 0x136   : > { %v750_v36 = vsel %vm747_vm11, %v736_v61, %v744_v29  ;;  %v754_v23 = vsel %vm747_vm11, %v744_v29, %v736_v61  ;;  %v442_v13 = vmul.f32 %v1909_v22, %v285_v10 }
 0x139   : > { %v758_v38 = vpop.permute.xlu1 %757  ;;  %v1996_v12 = vpop.permute.xlu0 %932  ;;  %843 = vrot.lane.b32.xlu0 %v1482_v7, %s1366_s8  ;;  %v557_v7 = vsel %vm552_vm5, %v1771_v18, %v1763_v30 }
 0x13a   : > { %v772_v31 = vmul.f32 %v758_v38, %v748_v21  ;;  %v773_v16 = vmul.f32 %v758_v38, %v752_v60  ;;  %v577_v24 = vmul.f32 %v1775_v28, %v557_v7  ;;  %v959_v21 = vsel %vm329_vm12, %v1898_v53, 0.0 }
 0x13c   : > { %v780_v32 = vadd.f32 %v772_v31, %v723_v46  ;;  %v781_v45 = vadd.f32 %v773_v16, %v724_v9 }
 0x13d   : > { %v766_v17 = vpop.permute.xlu1 %765  ;;  %847 = vrot.lane.b32.xlu0 %v1493_v11, %s1366_s8 }
 0x13e   : > { %v776_v46 = vmul.f32 %v766_v17, %v750_v36  ;;  %v777_v9 = vmul.f32 %v766_v17, %v754_v23  ;;  %v511_v33 = vpop.permute.xlu0 %510  ;;  %v295_v36 = vld [vmem:[%s2318_s6 + $0x8] sm:$0xff]  ;;  %v296_v17 = vld [vmem:[%s2318_s6 + $0x10] sm:$0xff] }
 0x13f   : > { %v528_v44 = vmul.f32 %v511_v33, %v1734_v1  ;;  %v529_v11 = vmul.f32 %v511_v33, %v1730_v63  ;;  %v2347_v23 = vld [vmem:[#allocation10_spill] sm:$0xff]  ;;  %v2349_v33 = vld [vmem:[#allocation7_spill] sm:$0xff] }
 0x140   : > { %v784_v49 = vadd.f32 %v776_v46, %v727_v0  ;;  %v785_v61 = vadd.f32 %v777_v9, %v728_v57 }
 0x141   : > { %v585_v30 = vadd.f32 %v577_v24, %v528_v44  ;;  %v586_v18 = vadd.f32 %v578_v35, %v529_v11  ;;  %v770_v60 = vpop.permute.xlu1 %769  ;;  %851 = vrot.lane.b32.xlu0 %v1485_v8, %s1366_s8  ;;  %v452_v8 = vsel %vm419_vm9, %v442_v13, 0.0  ;;  %v2350_v24 = vld [vmem:[#allocation6_spill] sm:$0xff]  ;;  %v2351_v13 = vld [vmem:[#allocation8_spill] sm:$0xff] }
 0x142   : > { %v778_v28 = vmul.f32 %v770_v60, %v1939_v20  ;;  %v779_v1 = vmul.f32 %v770_v60, %v1943_v14  ;;  %v2025_v29 = vadd.f32 %v959_v21, %v784_v49  ;;  %v2028_v63 = vadd.f32 %v785_v61, %v1901_v62 }
 0x143   : > { %v642_v22 = vadd.f32 %v1835_v56, %v585_v30  ;;  %v643_v0 = vadd.f32 %v1837_v25, %v586_v18  ;;  %v294_v25 = vld [vmem:[%s2318_s6] sm:$0xff]  ;;  %v503_v35 = vsel %vm499_vm4, %v2350_v24, %v2349_v33  ;;  %v507_v44 = vsel %vm499_vm4, %v2349_v33, %v2350_v24 }
 0x144   : > { %v2033_v53 = vadd.f32 %v778_v28, %v1948_v26  ;;  %v2036_v57 = vadd.f32 %v779_v1, %v1950_v59  ;;  %v288_v26 = vld [vmem:[%s2316_s4 + $0x10] sm:$0xff]  ;;  %v2352_v30 = vld [vmem:[#allocation9_spill] sm:$0xff] }
 0x145   : > { %453 = vadd.xlane.f32.xlu1 %v452_v8  ;;  %896 = vrot.lane.b32.xlu0 %v1637_v50, %s1367_s14  ;;  %v955_v62 = vsel %vm329_vm12, %v642_v22, 0.0  ;;  %v2042_v20 = vadd.f32 %v781_v45, %v643_v0  ;;  %v2059_v50 = vpop.permute.xlu1 %790  ;;  %v2353_v28 = vld [vmem:[#allocation13_spill] sm:$0xff]  ;;  %v2354_v22 = vld [vmem:[#allocation14_spill] sm:$0xff] }
 0x146   : > { %v2044_v56 = vadd.f32 %v955_v62, %v780_v32 }
 0x149   : > { %900 = vrot.lane.b32.xlu0 %v1645_v51, %s1367_s14  ;;  %v2062_v51 = vpop.permute.xlu1 %818 }
 0x14d   : > { %904 = vrot.lane.b32.xlu0 %v1653_v52, %s1367_s14 }
 0x151   : > { %908 = vrot.lane.b32.xlu0 %v1661_v54, %s1367_s14 }
 0x156   : > { %800 = vrot.lane.b32.xlu1 %v1547_v37, %s1362_s18 }
 0x15a   : > { %837 = vrot.lane.b32.xlu1 %v1474_v4, %s1366_s8  ;;  %v2066_v4 = vpop.permute.xlu1 %822 }
 0x15e   : > { %841 = vrot.lane.b32.xlu1 %v1468_v2, %s1366_s8  ;;  %v2069_v2 = vpop.permute.xlu1 %863 }
 0x162   : > { %845 = vrot.lane.b32.xlu1 %v1479_v6, %s1366_s8  ;;  %v2071_v6 = vpop.permute.xlu1 %871 }
 0x166   : > { %849 = vrot.lane.b32.xlu1 %v1471_v3, %s1366_s8  ;;  %v876_v37 = vpop.permute.xlu1 %875  ;;  %s1093_s8 = sshll.u32 %s2242_s23, 4  ;;  %s2265_s8 = int_to_ptr.vmem [resolvable:$true] %s1093_s8 }
 0x167   : > { %s1289_s18 = scalar_lea.vmem %s2265_s8, 1024  ;;  %p1296_p0 = scmp.lt.s32.totalorder %s2265_s8, %s1294_s16 }
 0x168   : > { %p1290_p11 = scmp.ne.s32.totalorder %s2265_s8, %s1289_s18 }
 0x16a   : > { %894 = vrot.lane.b32.xlu1 %v1588_v42, %s1367_s14  ;;  %v2073_v3 = vpop.permute.xlu1 %924  ;;  %v286_v42 = vld [vmem:[%s2316_s4] sm:$0xff]  ;;  %p1291_p12 = pnand %p1290_p11, %p1448_p5 }
 0x16c   : > { %p1292_p13 = pneg %p1291_p12 }
 0x16e   : > { %898 = vrot.lane.b32.xlu1 %v1597_v43, %s1367_s14  ;;  %v2075_v52 = vpop.permute.xlu1 %928  ;;  %v287_v43 = vld [vmem:[%s2316_s4 + $0x8] sm:$0xff] }
 0x172   : > { %902 = vrot.lane.b32.xlu1 %v1615_v47, %s1367_s14 }
 0x176   : > { %906 = vrot.lane.b32.xlu1 %v1623_v48, %s1367_s14  ;;  %s2262_s14 = scalar_lea.hbm %s2319_s7, %s1168_s29 }
 0x194   : > { %v445_v47 = vpop.xlane.xlu0 %444 }
 0x195   : > { %v455_v54 = vadd.f32 %v445_v47, %v286_v42  ;;  %v448_v48 = vpop.xlane.xlu1 %447 }
 0x196   : > { %v456_v14 = vadd.f32 %v448_v48, %v287_v43 }
 0x197   : > { %v991_v59 = vadd.f32 %v455_v54, %v1821_v40 }
 0x198   : > { %v992_v38 = vadd.f32 %v456_v14, %v2347_v23  ;;  %v451_v31 = vpop.xlane.xlu0 %450 }
 0x199   : > { %v995_v16 = vadd.f32 %v991_v59, %v294_v25  ;;  %v457_v32 = vadd.f32 %v451_v31, %v288_v26 }
 0x19a   : > { %v996_v45 = vadd.f32 %v992_v38, %v295_v36 }
 0x19b   : > { %v999_v10 = vsub.f32 0.0, %v995_v16  ;;  %v993_v7 = vadd.f32 %v457_v32, %v2348_v55 }
 0x19c   : > { %v1000_v46 = vsub.f32 0.0, %v996_v45 }
 0x19d   : > { %v997_v9 = vadd.f32 %v993_v7, %v296_v17  ;;  %1005 = vperm.xlu1 %1244, %v999_v10   ;;  %v793_v17 = vpop.permute.xlu1 %792 }
 0x19e   : > { %1010 = vperm.xlu0 %1243, %v1000_v46  }
 0x19f   : > { %v1001_v40 = vsub.f32 0.0, %v997_v9  ;;  %v289_v9 = vld [vmem:[%s2316_s4 + $0x18] sm:$0xff] }
 0x1a0   : > { %v526_v11 = vpop.permute.xlu0 %525 }
 0x1a1   : > { %v534_v49 = vmul.f32 %v526_v11, %v507_v44  ;;  %v535_v61 = vmul.f32 %v526_v11, %v503_v35  ;;  %1015 = vperm.xlu1 %1244, %v1001_v40   ;;  %v797_v7 = vpop.permute.xlu1 %796  ;;  %v297_v11 = vld [vmem:[%s2318_s6 + $0x18] sm:$0xff] }
 0x1a3   : > { %v591_v21 = vadd.f32 %v2351_v13, %v534_v49  ;;  %v592_v18 = vadd.f32 %v2352_v30, %v535_v61  ;;  %v2355_v61 = vld [vmem:[#allocation12_spill] sm:$0xff] }
 0x1a4   : > { %v795_v60 = vpop.permute.xlu0 %794 }
 0x1a5   : > { %v648_v1 = vadd.f32 %v2353_v28, %v591_v21  ;;  %v649_v0 = vadd.f32 %v2354_v22, %v592_v18  ;;  %v2356_v21 = vld [vmem:[#allocation5_spill] sm:$0xff] }
 0x1a6   : > { %vm332_vm0 = vcmp.lt.s32.totalorder %v2356_v21, 240 }
 0x1a7   : > { %v961_v8 = vsel %vm329_vm12, %v648_v1, 0.0  ;;  %v970_v62 = vadd.f32 %v2036_v57, %v649_v0 }
 0x1a8   : > { %v2113_v42 = vpop.permute.xlu0 %798  ;;  %v969_v43 = vadd.f32 %v961_v8, %v2033_v53 }
 0x1ac   : > { %v803_v47 = vpop.permute.xlu0 %802 }
 0x1ad   : > { %v808_v54 = vsel %vm804_vm13, %v795_v60, %v803_v47  ;;  %v812_v48 = vsel %vm804_vm13, %v803_v47, %v795_v60 }
 0x1ae   : > { %v835_v36 = vmul.f32 %v1976_v41, %v808_v54  ;;  %v836_v23 = vmul.f32 %v1976_v41, %v812_v48 }
 0x1b0   : > { %v2121_v25 = vpop.permute.xlu0 %839 }
 0x1b4   : > { %v844_v14 = vpop.permute.xlu0 %843 }
 0x1b8   : > { %v2123_v26 = vpop.permute.xlu0 %847 }
 0x1bc   : > { %v852_v57 = vpop.permute.xlu0 %851 }
 0x1bd   : > { %v857_v53 = vsel %vm853_vm14, %v844_v14, %v852_v57  ;;  %v861_v59 = vsel %vm853_vm14, %v852_v57, %v844_v14 }
 0x1be   : > { %v884_v38 = vmul.f32 %v876_v37, %v857_v53  ;;  %v885_v31 = vmul.f32 %v876_v37, %v861_v59 }
 0x1c0   : > { %v892_v16 = vadd.f32 %v884_v38, %v835_v36  ;;  %v893_v32 = vadd.f32 %v885_v31, %v836_v23  ;;  %v2132_v45 = vpop.permute.xlu0 %896 }
 0x1c4   : > { %v901_v10 = vpop.permute.xlu0 %900 }
 0x1c8   : > { %v2134_v55 = vpop.permute.xlu0 %904 }
 0x1cc   : > { %v909_v46 = vpop.permute.xlu0 %908 }
 0x1cd   : > { %v914_v41 = vsel %vm910_vm15, %v901_v10, %v909_v46  ;;  %v918_v37 = vsel %vm910_vm15, %v909_v46, %v901_v10 }
 0x1ce   : > { %v941_v40 = vmul.f32 %v1996_v12, %v914_v41  ;;  %v942_v33 = vmul.f32 %v1996_v12, %v918_v37  ;;  %v454_v24 = vpop.xlane.xlu1 %453 }
 0x1cf   : > { %v458_v35 = vadd.f32 %v454_v24, %v289_v9 }
 0x1d0   : > { %v950_v44 = vadd.f32 %v942_v33, %v893_v32  ;;  %v949_v49 = vadd.f32 %v941_v40, %v892_v16 }
 0x1d1   : > { %v994_v13 = vadd.f32 %v458_v35, %v2355_v61 }
 0x1d2   : > { %v801_v30 = vpop.permute.xlu1 %800  ;;  %v982_v18 = vsel %vm332_vm0, %v950_v44, 0.0  ;;  %v2153_v60 = vadd.f32 %v969_v43, %v949_v49  ;;  %v805_v43 = vsel %vm804_vm13, %v1956_v15, %v797_v7 }
 0x1d3   : > { %v998_v28 = vadd.f32 %v994_v13, %v297_v11  ;;  %v2155_v12 = vadd.f32 %v982_v18, %v970_v62  ;;  %v809_v62 = vsel %vm804_vm13, %v797_v7, %v1956_v15  ;;  %v829_v38 = vmul.f32 %v1964_v58, %v805_v43 }
 0x1d4   : > { %v830_v31 = vmul.f32 %v1964_v58, %v809_v62  ;;  %v807_v16 = vsel %vm804_vm13, %v793_v17, %v801_v30  ;;  %v811_v15 = vsel %vm804_vm13, %v801_v30, %v793_v17 }
 0x1d5   : > { %v1002_v1 = vsub.f32 0.0, %v998_v28  ;;  %v833_v40 = vmul.f32 %v2066_v4, %v807_v16  ;;  %v834_v17 = vmul.f32 %v2066_v4, %v811_v15 }
 0x1d6   : > { %v838_v22 = vpop.permute.xlu1 %837 }
 0x1d7   : > { %1020 = vperm.xlu1 %1244, %v1002_v1  }
 0x1da   : > { %v842_v0 = vpop.permute.xlu1 %841 }
 0x1de   : > { %v846_v8 = vpop.permute.xlu1 %845 }
 0x1df   : > { %v854_v48 = vsel %vm853_vm14, %v838_v22, %v846_v8  ;;  %v858_v14 = vsel %vm853_vm14, %v846_v8, %v838_v22  ;;  %v806_v8 = vsel %vm804_vm13, %v2059_v50, %v2113_v42 }
 0x1e0   : > { %v878_v53 = vmul.f32 %v2069_v2, %v854_v48  ;;  %v879_v59 = vmul.f32 %v2069_v2, %v858_v14 }
 0x1e2   : > { %v850_v47 = vpop.permute.xlu1 %849  ;;  %v886_v9 = vadd.f32 %v878_v53, %v829_v38  ;;  %v887_v41 = vadd.f32 %v879_v59, %v830_v31 }
 0x1e3   : > { %v856_v36 = vsel %vm853_vm14, %v842_v0, %v850_v47  ;;  %v860_v23 = vsel %vm853_vm14, %v850_v47, %v842_v0 }
 0x1e4   : > { %v882_v10 = vmul.f32 %v2071_v6, %v856_v36  ;;  %v883_v2 = vmul.f32 %v2071_v6, %v860_v23 }
 0x1e6   : > { %v895_v54 = vpop.permute.xlu1 %894  ;;  %v890_v6 = vadd.f32 %v882_v10, %v833_v40  ;;  %v891_v44 = vadd.f32 %v883_v2, %v834_v17 }
 0x1ea   : > { %v899_v57 = vpop.permute.xlu1 %898 }
 0x1ee   : > { %v903_v32 = vpop.permute.xlu1 %902 }
 0x1ef   : > { %v911_v7 = vsel %vm910_vm15, %v895_v54, %v903_v32  ;;  %v915_v46 = vsel %vm910_vm15, %v903_v32, %v895_v54  ;;  %v912_v54 = vsel %vm910_vm15, %v2132_v45, %v2134_v55 }
 0x1f0   : > { %v935_v58 = vmul.f32 %v1988_v34, %v911_v7  ;;  %v936_v37 = vmul.f32 %v1988_v34, %v915_v46 }
 0x1f2   : > { %v943_v33 = vadd.f32 %v935_v58, %v886_v9  ;;  %v944_v24 = vadd.f32 %v936_v37, %v887_v41  ;;  %v907_v35 = vpop.permute.xlu1 %906 }
 0x1f3   : > { %v913_v11 = vsel %vm910_vm15, %v899_v57, %v907_v35  ;;  %v917_v49 = vsel %vm910_vm15, %v907_v35, %v899_v57 }
 0x1f4   : > { %v939_v61 = vmul.f32 %v2075_v52, %v913_v11  ;;  %v940_v13 = vmul.f32 %v2075_v52, %v917_v49  ;;  %v976_v34 = vsel %vm332_vm0, %v944_v24, 0.0  ;;  %v983_v4 = vadd.f32 %v2044_v56, %v943_v33  ;;  %v1282_v49 = vld [vmem:[%s1465_s17 + $0x8] sm:$0xff] }
 0x1f5   : > { %v984_v30 = vadd.f32 %v976_v34, %v2042_v20  ;;  %v859_v52 = vsel %vm853_vm14, %v2123_v26, %v2121_v25  ;;  %v810_v56 = vsel %vm804_vm13, %v2113_v42, %v2059_v50  ;;  %v916_v20 = vsel %vm910_vm15, %v2134_v55, %v2132_v45  ;;  %v1283_v34 = vld [vmem:[%s1465_s17 + $0x10] sm:$0xff] }
 0x1f6   : > { %v947_v18 = vadd.f32 %v939_v61, %v890_v6  ;;  %v948_v28 = vadd.f32 %v940_v13, %v891_v44  ;;  %v832_v47 = vmul.f32 %v2062_v51, %v810_v56  ;;  %v938_v48 = vmul.f32 %v2073_v3, %v916_v20  ;;  %v1281_v6 = vld [vmem:[%s1465_s17] sm:$0xff] }
 0x1f8   : > { %v980_v1 = vsel %vm332_vm0, %v948_v28, 0.0  ;;  %v987_v22 = vadd.f32 %v2025_v29, %v947_v18  ;;  %v855_v29 = vsel %vm853_vm14, %v2121_v25, %v2123_v26  ;;  %v831_v25 = vmul.f32 %v2062_v51, %v806_v8  ;;  %v1284_v18 = vld [vmem:[%s1465_s17 + $0x18] sm:$0xff] }
 0x1f9   : > { %v988_v0 = vadd.f32 %v980_v1, %v2028_v63  ;;  %v881_v63 = vmul.f32 %v1980_v39, %v859_v52  ;;  %v880_v14 = vmul.f32 %v1980_v39, %v855_v29  ;;  %v937_v26 = vmul.f32 %v2073_v3, %v912_v54  ;;  %v1286_v52 = vld [vmem:[%s1465_s17 + $0x28] sm:$0xff] }
 0x1fb   : > { %v889_v57 = vadd.f32 %v881_v63, %v832_v47  ;;  %v888_v62 = vadd.f32 %v880_v14, %v831_v25 }
 0x1fd   : > { %v946_v43 = vadd.f32 %v938_v48, %v889_v57  ;;  %v945_v53 = vadd.f32 %v937_v26, %v888_v62 }
 0x1ff   : > { %v978_v50 = vsel %vm332_vm0, %v946_v43, 0.0  ;;  %v985_v59 = vadd.f32 %v1969_v5, %v945_v53  ;;  %v1288_v43 = vld [vmem:[%s1465_s17 + $0x38] sm:$0xff] }
 0x200   : > { %v986_v27 = vadd.f32 %v978_v50, %v1972_v19 }
 0x218   : > { %v1006_v42 = vpop.permute.xlu1 %1005 }
 0x219   : > { %v1023_v45 = vsub.f32 %v1006_v42, %v983_v4  ;;  %v1024_v55 = vsub.f32 %v1006_v42, %v984_v30  ;;  %v1011_v36 = vpop.permute.xlu0 %1010 }
 0x21a   : > { %v1025_v39 = vsub.f32 %v1011_v36, %v985_v59  ;;  %v1026_v23 = vsub.f32 %v1011_v36, %v986_v27 }
 0x21b   : > { %v1031_v38 = vmul.f32 1.442695, %v1023_v45  ;;  %v1033_v51 = vmul.f32 1.442695, %v1024_v55 }
 0x21c   : > { %v1035_v31 = vmul.f32 1.442695, %v1025_v39  ;;  %v1037_v3 = vmul.f32 1.442695, %v1026_v23  ;;  %v1016_v16 = vpop.permute.xlu1 %1015 }
 0x21d   : > { %1249 = vpow2.f32 %v1031_v38  ;;  %v1027_v15 = vsub.f32 %v1016_v16, %v987_v22  ;;  %v1028_v32 = vsub.f32 %v1016_v16, %v988_v0  ;;  %v1285_v22 = vld [vmem:[%s1465_s17 + $0x20] sm:$0xff] }
 0x21e   : > { %1251 = vpow2.f32 %v1033_v51 }
 0x21f   : > { %1253 = vpow2.f32 %v1035_v31  ;;  %v1039_v21 = vmul.f32 1.442695, %v1027_v15  ;;  %v1041_v10 = vmul.f32 1.442695, %v1028_v32 }
 0x220   : > { %1255 = vpow2.f32 %v1037_v3 }
 0x221   : > { %1257 = vpow2.f32 %v1039_v21 }
 0x222   : > { %1259 = vpow2.f32 %v1041_v10 }
 0x22a   : > { %v1250_v5 = vpop.eup %1249 }
 0x22b   : > { %v1252_v19 = vpop.eup %1251  ;;  %v1047_v2 = vadd.f32 1.0, %v1250_v5 }
 0x22c   : > { %v1254_v7 = vpop.eup %1253  ;;  %v1048_v46 = vadd.f32 1.0, %v1252_v19 }
 0x22d   : > { %v1256_v9 = vpop.eup %1255  ;;  %1261 = vrcp.f32 %v1047_v2  ;;  %v1049_v41 = vadd.f32 1.0, %v1254_v7 }
 0x22e   : > { %v1258_v58 = vpop.eup %1257  ;;  %1263 = vrcp.f32 %v1048_v46  ;;  %v1050_v37 = vadd.f32 1.0, %v1256_v9 }
 0x22f   : > { %v1260_v40 = vpop.eup %1259  ;;  %1265 = vrcp.f32 %v1049_v41  ;;  %v1051_v17 = vadd.f32 1.0, %v1258_v58 }
 0x230   : > { %1267 = vrcp.f32 %v1050_v37  ;;  %v1052_v33 = vadd.f32 1.0, %v1260_v40 }
 0x231   : > { %1269 = vrcp.f32 %v1051_v17 }
 0x232   : > { %1271 = vrcp.f32 %v1052_v33 }
 0x23a   : > { %v1262_v24 = vpop.eup %1261 }
 0x23b   : > { %v1264_v35 = vpop.eup %1263  ;;  %v1063_v44 = vmul.f32 %v1281_v6, %v1262_v24 }
 0x23c   : > { %v1266_v11 = vpop.eup %1265  ;;  %v1064_v61 = vmul.f32 %v1282_v49, %v1264_v35 }
 0x23d   : > { %v1268_v13 = vpop.eup %1267  ;;  %1071 = vst [vmem:[%s2242_s23] sm:$0xff] %v1063_v44  ;;  %v1065_v4 = vmul.f32 %v1283_v34, %v1266_v11 }
 0x23e   : > { %v1270_v30 = vpop.eup %1269  ;;  %1072 = vst [vmem:[%s2242_s23 + $0x8] sm:$0xff] %v1064_v61  ;;  %v1066_v28 = vmul.f32 %v1284_v18, %v1268_v13 }
 0x23f   : > { %v1272_v1 = vpop.eup %1271  ;;  %1073 = vst [vmem:[%s2242_s23 + $0x10] sm:$0xff] %v1065_v4  ;;  %v1067_v0 = vmul.f32 %v1285_v22, %v1270_v30 }
 0x240   : > { %1074 = vst [vmem:[%s2242_s23 + $0x18] sm:$0xff] %v1066_v28  ;;  %v1068_v56 = vmul.f32 %v1286_v52, %v1272_v1 }
 0x241   : > { %1075 = vst [vmem:[%s2242_s23 + $0x20] sm:$0xff] %v1067_v0 }
 0x242   : > { %1076 = vst [vmem:[%s2242_s23 + $0x28] sm:$0xff] %v1068_v56 }
 0x252   : > { %v1021_v20 = vpop.permute.xlu1 %1020 }
 0x253   : > { %v1029_v29 = vsub.f32 %v1021_v20, %v2153_v60  ;;  %v1030_v63 = vsub.f32 %v1021_v20, %v2155_v12  ;;  %v1287_v12 = vld [vmem:[%s1465_s17 + $0x30] sm:$0xff]  ;;  %s1295_s17 = scalar_lea.vmem %s1294_s16, 2048 }
 0x254   : > { %p1297_p1 = scmp.lt.s32.totalorder %s1295_s17, %s1289_s18 }
 0x255   : > { %v1043_v8 = vmul.f32 1.442695, %v1029_v29  ;;  %v1045_v47 = vmul.f32 1.442695, %v1030_v63 }
 0x256   : > { %p1298_p2 = por %p1297_p1, %p1296_p0 }
 0x257   : > { %1273 = vpow2.f32 %v1043_v8 }
 0x258   : > { %1275 = vpow2.f32 %v1045_v47  ;;  %p1299_p3 = pnand %p1298_p2, %p1292_p13 }
 0x264   : > { %v1274_v54 = vpop.eup %1273 }
 0x265   : > { %v1276_v48 = vpop.eup %1275  ;;  %v1053_v14 = vadd.f32 1.0, %v1274_v54 }
 0x266   : > { %v1054_v57 = vadd.f32 1.0, %v1276_v48 }
 0x267   : > { %1277 = vrcp.f32 %v1053_v14 }
 0x268   : > { %1279 = vrcp.f32 %v1054_v57 }
 0x274   : > { %v1278_v60 = vpop.eup %1277 }
 0x275   : > { %v1280_v25 = vpop.eup %1279  ;;  %v1069_v26 = vmul.f32 %v1287_v12, %v1278_v60 }
 0x276   : > { %v1070_v62 = vmul.f32 %v1288_v43, %v1280_v25 }
 0x277   : > { %1077 = vst [vmem:[%s2242_s23 + $0x30] sm:$0xff] %v1069_v26 }
 0x278   : > { %1078 = vst [vmem:[%s2242_s23 + $0x38] sm:$0xff] %v1070_v62 }
 0x279   : > { %1302 = shalt.err (!%p1299_p3)
}
 0x27a   : > { %s1303_s19 = scalar_lea.hbm %s2262_s14, 1024  ;;  %s1307_s23 = scalar_lea.hbm %s2319_s7, 2048 }
 0x27b   : > { %p1304_p4 = scmp.ne.s32.totalorder %s2262_s14, %s1303_s19  ;;  %p1308_p9 = scmp.lt.s32.totalorder %s2262_s14, %s2319_s7 }
 0x27c   : > { %p1309_p10 = scmp.lt.s32.totalorder %s1307_s23, %s1303_s19 }
 0x27d   : > { %p1305_p7 = pnand %p1304_p4, %p1448_p5 }
 0x27e   : > { %p1310_p11 = por %p1309_p10, %p1308_p9 }
 0x27f   : > { %p1306_p8 = pneg %p1305_p7 }
 0x281   : > { %p1311_p12 = pnand %p1310_p11, %p1306_p8 }
 0x283   : > { %1314 = shalt.err (!%p1311_p12)
}
 0x284   : > { %s1369_s13 = smov 256  }
 0x285   : > { %1169 = dma.vmem_to_hbm [thread:$0]  (%p1448_p5), %s2265_s8, 1024, %s2262_s14, %s2271_s28, %s1369_s13, %s1369_s13, %s1354_s21  }
 0x286 PF: > { %p1175_p13 = scmp.ge.s32.totalorder %s1349_s27, 2  ;;  %s1108_s18 = sand.u32 1, %s1337_s24  }
 0x287   : > { %s1109_s15 = scalar_lea.sflag [#allocation3], %s1108_s18 }
 0x288   : > { %p1172_p0 = pnand %p1175_p13, %p1452_p6 }
 0x28a   : > { %p1173_p1 = pneg %p1172_p0 }
 0x28c   : > { %1332 = dma.done.wait (%p1173_p1), %s1109_s15, 1024  }
 0x28d   : > { %1334 = vsyncadd (%p1173_p1), %s1109_s15, 4294966272  ;;  %p17_p2 = scmp.ge.s32.totalorder %s1435_s30, 4   ;;  %s2357_s24 = smov %s1341_s25 }
 0x28e   : > { %s2358_s25 = smov %s1345_s26  ;;  %s2359_s26 = smov %s1446_s10 }
 0x28f   : > { %s2360_s27 = smov %s1435_s30  ;;  %19 = sbr.rel (!%p17_p2) target bundleno = 3 (0x3), region = 83 }
 0x294   :  { %1114 = vsyncpa [#allocation3], 1 }
 0x295   :  { %1116 = vsyncpa [#allocation3 + $0x1], 1 }

</bundles_post_ra>
